<compile_context>
chip_gen: v6e
topology: v6e:2x2x1
jax: 0.10.0
libtpu: 0.0.40
codegen_flags: <defaults>
</compile_context>

<pallas_src>
import functools
import math

import jax
import jax.numpy as jnp
from jax.experimental import pallas as pl
from jax.experimental.pallas import tpu as pltpu

# ---------------- small synthetic BERT config ----------------
VOCAB_SIZE = 100
TYPE_VOCAB_SIZE = 2
MAX_POS = 32
HIDDEN = 32
NUM_LAYERS = 2
NUM_HEADS = 2
HEAD_DIM = HIDDEN // NUM_HEADS
INTERMEDIATE = 64
CLASS_NUM = 5
CLS_PAD = 128                     # lane-dense classifier output width
LN_EPS = 1e-12
VMEM_LIMIT_BYTES = 32 * 1024 * 1024   # explicit scoped-VMEM limit (safe on v5e/v6e/v7x)


def _token_tile(m):
    """Token-tile size: 1 grid step at toy sizes, 256/512-wide tiles at real sizes."""
    for tm in (512, 256, 128, 64, 32, 16, 8):
        if tm <= m and m % tm == 0:
            return tm
    return m


def _ln(y, g, b, eps):
    """f32 LayerNorm over the last axis; variance via E[x^2]-E[x]^2 (one data pass)."""
    mu = jnp.mean(y, axis=-1, keepdims=True)
    msq = jnp.mean(y * y, axis=-1, keepdims=True)
    var = msq - mu * mu
    return (y - mu) * jax.lax.rsqrt(var + eps) * g + b


# ---------------- Pallas kernels ----------------
def _encoder_layer_kernel(x_ref, m_ref,
                          wqkv_ref, bqkv_ref, wo_ref, bo_ref,
                          ln1_g_ref, ln1_b_ref,
                          w1_ref, b1_ref, w2_ref, b2_ref,
                          ln2_g_ref, ln2_b_ref,
                          ln0_g_ref, ln0_b_ref,
                          o_ref,
                          qkv_ref, ctx_ref,
                          *, num_heads, head_dim, eps, input_ln):
    """One fully fused BERT encoder layer for one batch element.

    x:[1,S,H] bf16 (residual stream kept f32 inside the kernel)
    mask:[1,1,S] additive ((1-m)*-1e4)
    wqkv:[H,3H] bf16 (1/sqrt(D) pre-folded into the Q columns), wo:[H,H] bf16
    w1:[H,I] bf16, w2:[I,H] bf16; biases / LN params f32.
    Scratch: qkv:[S,3H] f32, ctx:[S,H] f32.
    """
    H = num_heads * head_dim
    x = x_ref[0].astype(jnp.float32)                       # [S, H]

    if input_ln:                                           # static: layer 0 only —
        x = _ln(x, ln0_g_ref[...], ln0_b_ref[...], eps)    # fused embedding LayerNorm

    mask = m_ref[0]                                        # [1, S] additive

    # Fused QKV projection: one MXU pass over the stacked [H, 3H] weight.
    # (q-scale already folded into the weight; attention dropout = identity/eval)
    qkv_ref[...] = jnp.dot(x.astype(jnp.bfloat16), wqkv_ref[...],
                           preferred_element_type=jnp.float32) + bqkv_ref[...]

    # Per-head attention.  q/k/v head windows are static ref slices of the VMEM
    # scratch (no value-level relayout); per-head context goes into ctx scratch
    # so the output projection below is a single matmul with full K=H depth.
    for h in range(num_heads):
        lo, hi = h * head_dim, (h + 1) * head_dim
        qh = qkv_ref[:, lo:hi].astype(jnp.bfloat16)                 # [S, D]
        kh = qkv_ref[:, H + lo:H + hi].astype(jnp.bfloat16)
        vh = qkv_ref[:, 2 * H + lo:2 * H + hi].astype(jnp.bfloat16)
        s = jax.lax.dot_general(qh, kh, (((1,), (1,)), ((), ())),
                                preferred_element_type=jnp.float32)  # [S, S]
        s = s + mask
        s = s - jnp.max(s, axis=-1, keepdims=True)
        p = jnp.exp(s)
        p = p * pl.reciprocal(jnp.sum(p, axis=-1, keepdims=True), approx=True)
        ctx_ref[:, lo:hi] = jnp.dot(p.astype(jnp.bfloat16), vh,
                                    preferred_element_type=jnp.float32)

    # Single output projection (K = H) + residual + LN1.
    attn = jnp.dot(ctx_ref[...].astype(jnp.bfloat16), wo_ref[...],
                   preferred_element_type=jnp.float32) + bo_ref[...]
    y1 = _ln(attn + x, ln1_g_ref[...], ln1_b_ref[...], eps)

    # FFN + residual + LN2 (hidden dropout = identity in eval).
    h1 = jnp.dot(y1.astype(jnp.bfloat16), w1_ref[...],
                 preferred_element_type=jnp.float32) + b1_ref[...]
    # TODO(synk): HF BERT default is erf-GELU; tanh-approx GELU used here (EUP friendly).
    h1 = jax.nn.gelu(h1, approximate=True)
    ff = jnp.dot(h1.astype(jnp.bfloat16), w2_ref[...],
                 preferred_element_type=jnp.float32) + b2_ref[...]
    y2 = _ln(ff + y1, ln2_g_ref[...], ln2_b_ref[...], eps)

    o_ref[0] = y2.astype(o_ref.dtype)                      # bf16 residual stream to HBM


def _cls_kernel(x_ref, w_ref, b_ref, o_ref):
    """Classifier: lane-dense (padded to 128) output; sliced to CLASS_NUM outside."""
    y = jnp.dot(x_ref[...], w_ref[...], preferred_element_type=jnp.float32) + b_ref[...]
    o_ref[...] = y.astype(o_ref.dtype)


# ---------------- wrappers around pallas_call ----------------
def encoder_layer(x3, amask, p, emb_ln_g, emb_ln_b, *, input_ln):
    B, S, H = x3.shape
    H3 = 3 * H
    I = p["w1"].shape[1]
    kernel = functools.partial(_encoder_layer_kernel,
                               num_heads=NUM_HEADS, head_dim=HEAD_DIM,
                               eps=LN_EPS, input_ln=input_ln)
    # NOTE: at real sizes, add pipeline_mode=pl.Buffered(1) to the constant-index
    # (block-invariant) weight/bias/LN specs below to single-buffer them.
    return pl.pallas_call(
        kernel,
        out_shape=jax.ShapeDtypeStruct((B, S, H), jnp.bfloat16),
        grid=(B,),
        in_specs=[
            pl.BlockSpec((1, S, H), lambda b: (b, 0, 0)),   # x (bf16 residual stream)
            pl.BlockSpec((1, 1, S), lambda b: (b, 0, 0)),   # additive attention mask
            pl.BlockSpec((H, H3), lambda b: (0, 0)),        # stacked QKV weight (bf16)
            pl.BlockSpec((1, H3), lambda b: (0, 0)),        # stacked QKV bias
            pl.BlockSpec((H, H), lambda b: (0, 0)),         # output proj weight (bf16)
            pl.BlockSpec((1, H), lambda b: (0, 0)),         # output proj bias
            pl.BlockSpec((1, H), lambda b: (0, 0)),         # ln1 gamma
            pl.BlockSpec((1, H), lambda b: (0, 0)),         # ln1 beta
            pl.BlockSpec((H, I), lambda b: (0, 0)),         # FFN W1 (bf16)
            pl.BlockSpec((1, I), lambda b: (0, 0)),         # FFN b1
            pl.BlockSpec((I, H), lambda b: (0, 0)),         # FFN W2 (bf16)
            pl.BlockSpec((1, H), lambda b: (0, 0)),         # FFN b2
            pl.BlockSpec((1, H), lambda b: (0, 0)),         # ln2 gamma
            pl.BlockSpec((1, H), lambda b: (0, 0)),         # ln2 beta
            pl.BlockSpec((1, H), lambda b: (0, 0)),         # embedding-LN gamma (layer 0 only)
            pl.BlockSpec((1, H), lambda b: (0, 0)),         # embedding-LN beta  (layer 0 only)
        ],
        out_specs=pl.BlockSpec((1, S, H), lambda b: (b, 0, 0)),
        scratch_shapes=[
            pltpu.VMEM((S, H3), jnp.float32),   # stacked qkv (head windows ref-sliced)
            pltpu.VMEM((S, H), jnp.float32),    # per-head context -> single K=H projection
        ],
        compiler_params=pltpu.CompilerParams(
            dimension_semantics=("parallel",),
            vmem_limit_bytes=VMEM_LIMIT_BYTES,
        ),
    )(x3, amask,
      p["wqkv"], p["bqkv"].reshape(1, H3), p["wo"], p["bo"].reshape(1, H),
      p["ln1_g"].reshape(1, H), p["ln1_b"].reshape(1, H),
      p["w1"], p["b1"].reshape(1, I), p["w2"], p["b2"].reshape(1, H),
      p["ln2_g"].reshape(1, H), p["ln2_b"].reshape(1, H),
      emb_ln_g.reshape(1, H), emb_ln_b.reshape(1, H))


def classifier(x, w_pad, b_pad):
    M, H = x.shape
    N = w_pad.shape[1]
    tm = _token_tile(M)
    return pl.pallas_call(
        _cls_kernel,
        out_shape=jax.ShapeDtypeStruct((M, N), jnp.float32),
        grid=(M // tm,),
        in_specs=[
            pl.BlockSpec((tm, H), lambda i: (i, 0)),
            pl.BlockSpec((H, N), lambda i: (0, 0)),
            pl.BlockSpec((1, N), lambda i: (0, 0)),
        ],
        out_specs=pl.BlockSpec((tm, N), lambda i: (i, 0)),
        compiler_params=pltpu.CompilerParams(
            dimension_semantics=("parallel",),
            vmem_limit_bytes=VMEM_LIMIT_BYTES,
        ),
    )(x, w_pad, b_pad.reshape(1, N))


# ---------------- model ----------------
def init_params(key):
    def nrm(k, shape, scale=0.02):
        return scale * jax.random.normal(k, shape, dtype=jnp.float32)

    keys = jax.random.split(key, 4 + NUM_LAYERS)
    cls_w = nrm(keys[3], (HIDDEN, CLASS_NUM))
    cls_w_pad = jnp.zeros((HIDDEN, CLS_PAD), jnp.float32).at[:, :CLASS_NUM].set(cls_w)
    params = {
        "word_emb": nrm(keys[0], (VOCAB_SIZE, HIDDEN)),
        "pos_emb": nrm(keys[1], (MAX_POS, HIDDEN)),
        "type_emb": nrm(keys[2], (TYPE_VOCAB_SIZE, HIDDEN)),
        "emb_ln_g": jnp.ones((HIDDEN,), jnp.float32),
        "emb_ln_b": jnp.zeros((HIDDEN,), jnp.float32),
        # weights feeding the MXU are stored bf16; biases / LN params stay f32
        "cls_w": cls_w_pad.astype(jnp.bfloat16),
        "cls_b": jnp.zeros((CLS_PAD,), jnp.float32),
        "layers": [],
    }
    q_scale = 1.0 / math.sqrt(HEAD_DIM)
    for l in range(NUM_LAYERS):
        lk = jax.random.split(keys[4 + l], 4)
        wqkv = nrm(lk[0], (HIDDEN, 3 * HIDDEN))
        # Fold the 1/sqrt(head_dim) attention scale into the Q columns (static
        # weight transform -> no runtime multiply in the kernel).
        wqkv = wqkv.at[:, :HIDDEN].multiply(q_scale)
        bqkv = jnp.zeros((3 * HIDDEN,), jnp.float32).at[:HIDDEN].multiply(q_scale)
        params["layers"].append({
            "wqkv": wqkv.astype(jnp.bfloat16),          # stacked Q|K|V, Q pre-scaled
            "bqkv": bqkv,
            "wo": nrm(lk[1], (HIDDEN, HIDDEN)).astype(jnp.bfloat16),
            "bo": jnp.zeros((HIDDEN,), jnp.float32),
            "ln1_g": jnp.ones((HIDDEN,), jnp.float32),
            "ln1_b": jnp.zeros((HIDDEN,), jnp.float32),
            "w1": nrm(lk[2], (HIDDEN, INTERMEDIATE)).astype(jnp.bfloat16),
            "b1": jnp.zeros((INTERMEDIATE,), jnp.float32),
            "w2": nrm(lk[3], (INTERMEDIATE, HIDDEN)).astype(jnp.bfloat16),
            "b2": jnp.zeros((HIDDEN,), jnp.float32),
            "ln2_g": jnp.ones((HIDDEN,), jnp.float32),
            "ln2_b": jnp.zeros((HIDDEN,), jnp.float32),
        })
    return params


def bert_softmax_ner_forward(params, input_ids, attention_mask, token_type_ids):
    B, S = input_ids.shape
    # --- embeddings (data-dependent gathers kept in plain JAX as glue) ---
    pos_ids = jnp.arange(S)
    emb = (params["word_emb"][input_ids]
           + params["pos_emb"][pos_ids][None, :, :]
           + params["type_emb"][token_type_ids])
    # Embedding LayerNorm + dropout(eval=identity) are fused into layer 0's kernel;
    # the HBM residual stream is bf16 everywhere.
    x3 = emb.astype(jnp.bfloat16)                                   # [B, S, H] bf16

    # --- extended attention mask: (1 - m) * -10000, shared across heads ---
    amask = ((1.0 - attention_mask.astype(jnp.float32)) * -10000.0).reshape(B, 1, S)

    # --- encoder stack: ONE fused pallas_call per layer ---
    for li, p in enumerate(params["layers"]):
        x3 = encoder_layer(x3, amask, p,
                           params["emb_ln_g"], params["emb_ln_b"],
                           input_ln=(li == 0))

    # outputs[0] -> self.drop (identity in eval) -> cls_layer (lane-padded, sliced here)
    x = x3.reshape(B * S, HIDDEN)
    logits_pad = classifier(x, params["cls_w"], params["cls_b"])
    return logits_pad[:, :CLASS_NUM].reshape(B, S, CLASS_NUM)


if __name__ == "__main__":
    B, S = 2, 8
    key = jax.random.PRNGKey(0)
    k_ids, k_params = jax.random.split(key, 2)

    input_ids = jax.random.randint(k_ids, (B, S), 0, VOCAB_SIZE, dtype=jnp.int32)
    attention_mask = jnp.ones((B, S), jnp.int32).at[:, -2:].set(0)   # last 2 tokens are padding
    token_type_ids = jnp.zeros((B, S), jnp.int32)

    params = init_params(k_params)
    logits = jax.jit(bert_softmax_ner_forward)(params, input_ids, attention_mask, token_type_ids)
    jax.block_until_ready(logits)
    assert logits.shape == (B, S, CLASS_NUM) and logits.dtype == jnp.float32
    print("KERNEL_OK")
</pallas_src>

<mosaic_0001>
module attributes {stable_mosaic.version = 11 : i64} {
  func.func @_cls_kernel(%arg0: i32, %arg1: memref<16x32xbf16, #tpu.memory_space<vmem>>, %arg2: memref<32x128xbf16, #tpu.memory_space<vmem>>, %arg3: memref<1x128xf32, #tpu.memory_space<vmem>>, %arg4: memref<16x128xf32, #tpu.memory_space<vmem>>) attributes {dimension_semantics = [#tpu.dimension_semantics<parallel>], iteration_bounds = array<i64: 1>, scalar_prefetch = 0 : i64, scratch_operands = 0 : i64, tpu.core_type = #tpu.core_type<tc>, window_params = [{transform_indices = @transform_0, window_bounds = array<i64: 16, 32>}, {pipeline_mode = #tpu.pipeline_mode<synchronous>, transform_indices = @transform_1, window_bounds = array<i64: 32, 128>}, {pipeline_mode = #tpu.pipeline_mode<synchronous>, transform_indices = @transform_2, window_bounds = array<i64: 1, 128>}, {transform_indices = @transform_3, window_bounds = array<i64: 16, 128>}]} {
    %c0 = arith.constant 0 : index
    %c0_0 = arith.constant 0 : index
    %0 = vector.load %arg1[%c0, %c0_0] : memref<16x32xbf16, #tpu.memory_space<vmem>>, vector<16x32xbf16>
    %c0_1 = arith.constant 0 : index
    %c0_2 = arith.constant 0 : index
    %1 = vector.load %arg2[%c0_1, %c0_2] : memref<32x128xbf16, #tpu.memory_space<vmem>>, vector<32x128xbf16>
    %cst = arith.constant dense<0.000000e+00> : vector<16x128xf32>
    %2 = tpu.matmul %0, %1, %cst {dimension_numbers = #tpu.dot_dimension_numbers<[1], [0], [0], [1], [0, 0, 1, 1], [], []>} : vector<16x32xbf16>, vector<32x128xbf16>, vector<16x128xf32> -> vector<16x128xf32>
    %c0_3 = arith.constant 0 : index
    %c0_4 = arith.constant 0 : index
    %3 = vector.load %arg3[%c0_3, %c0_4] : memref<1x128xf32, #tpu.memory_space<vmem>>, vector<1x128xf32>
    %4 = vector.broadcast %3 : vector<1x128xf32> to vector<16x128xf32>
    %5 = arith.addf %2, %4 : vector<16x128xf32>
    %c0_5 = arith.constant 0 : index
    %c0_6 = arith.constant 0 : index
    %6 = vector.load %arg4[%c0_5, %c0_6] : memref<16x128xf32, #tpu.memory_space<vmem>>, vector<16x128xf32>
    tpu.vector_store %arg4[%c0_5, %c0_6], %5 {strides = array<i32>} : memref<16x128xf32, #tpu.memory_space<vmem>>, vector<16x128xf32>,
    return
  }
  func.func @transform_0(%arg0: i32) -> (i32, i32) {
    %c0_i32 = arith.constant 0 : i32
    %c0_i32_0 = arith.constant 0 : i32
    return %arg0, %c0_i32 : i32, i32
  }
  func.func @transform_1(%arg0: i32) -> (i32, i32) {
    %c0_i32 = arith.constant 0 : i32
    %c0_i32_0 = arith.constant 0 : i32
    %c0_i32_1 = arith.constant 0 : i32
    return %c0_i32, %c0_i32_0 : i32, i32
  }
  func.func @transform_2(%arg0: i32) -> (i32, i32) {
    %c0_i32 = arith.constant 0 : i32
    %c0_i32_0 = arith.constant 0 : i32
    %c0_i32_1 = arith.constant 0 : i32
    return %c0_i32, %c0_i32_0 : i32, i32
  }
  func.func @transform_3(%arg0: i32) -> (i32, i32) {
    %c0_i32 = arith.constant 0 : i32
    %c0_i32_0 = arith.constant 0 : i32
    return %arg0, %c0_i32 : i32, i32
  }
}

module attributes {stable_mosaic.version = 11 : i64} {
  func.func @_encoder_layer_kernel(%arg0: i32, %arg1: memref<1x8x32xbf16, #tpu.memory_space<vmem>>, %arg2: memref<1x1x8xf32, #tpu.memory_space<vmem>>, %arg3: memref<32x96xbf16, #tpu.memory_space<vmem>>, %arg4: memref<1x96xf32, #tpu.memory_space<vmem>>, %arg5: memref<32x32xbf16, #tpu.memory_space<vmem>>, %arg6: memref<1x32xf32, #tpu.memory_space<vmem>>, %arg7: memref<1x32xf32, #tpu.memory_space<vmem>>, %arg8: memref<1x32xf32, #tpu.memory_space<vmem>>, %arg9: memref<32x64xbf16, #tpu.memory_space<vmem>>, %arg10: memref<1x64xf32, #tpu.memory_space<vmem>>, %arg11: memref<64x32xbf16, #tpu.memory_space<vmem>>, %arg12: memref<1x32xf32, #tpu.memory_space<vmem>>, %arg13: memref<1x32xf32, #tpu.memory_space<vmem>>, %arg14: memref<1x32xf32, #tpu.memory_space<vmem>>, %arg15: memref<1x32xf32, #tpu.memory_space<vmem>>, %arg16: memref<1x32xf32, #tpu.memory_space<vmem>>, %arg17: memref<1x8x32xbf16, #tpu.memory_space<vmem>>, %arg18: memref<8x96xf32, #tpu.memory_space<vmem>>, %arg19: memref<8x32xf32, #tpu.memory_space<vmem>>) attributes {dimension_semantics = [#tpu.dimension_semantics<parallel>], iteration_bounds = array<i64: 2>, scalar_prefetch = 0 : i64, scratch_operands = 2 : i64, tpu.core_type = #tpu.core_type<tc>, window_params = [{transform_indices = @transform_0, window_bounds = array<i64: 1, 8, 32>}, {transform_indices = @transform_1, window_bounds = array<i64: 1, 1, 8>}, {pipeline_mode = #tpu.pipeline_mode<synchronous>, transform_indices = @transform_2, window_bounds = array<i64: 32, 96>}, {pipeline_mode = #tpu.pipeline_mode<synchronous>, transform_indices = @transform_3, window_bounds = array<i64: 1, 96>}, {pipeline_mode = #tpu.pipeline_mode<synchronous>, transform_indices = @transform_4, window_bounds = array<i64: 32, 32>}, {pipeline_mode = #tpu.pipeline_mode<synchronous>, transform_indices = @transform_5, window_bounds = array<i64: 1, 32>}, {pipeline_mode = #tpu.pipeline_mode<synchronous>, transform_indices = @transform_6, window_bounds = array<i64: 1, 32>}, {pipeline_mode = #tpu.pipeline_mode<synchronous>, transform_indices = @transform_7, window_bounds = array<i64: 1, 32>}, {pipeline_mode = #tpu.pipeline_mode<synchronous>, transform_indices = @transform_8, window_bounds = array<i64: 32, 64>}, {pipeline_mode = #tpu.pipeline_mode<synchronous>, transform_indices = @transform_9, window_bounds = array<i64: 1, 64>}, {pipeline_mode = #tpu.pipeline_mode<synchronous>, transform_indices = @transform_10, window_bounds = array<i64: 64, 32>}, {pipeline_mode = #tpu.pipeline_mode<synchronous>, transform_indices = @transform_11, window_bounds = array<i64: 1, 32>}, {pipeline_mode = #tpu.pipeline_mode<synchronous>, transform_indices = @transform_12, window_bounds = array<i64: 1, 32>}, {pipeline_mode = #tpu.pipeline_mode<synchronous>, transform_indices = @transform_13, window_bounds = array<i64: 1, 32>}, {pipeline_mode = #tpu.pipeline_mode<synchronous>, transform_indices = @transform_14, window_bounds = array<i64: 1, 32>}, {pipeline_mode = #tpu.pipeline_mode<synchronous>, transform_indices = @transform_15, window_bounds = array<i64: 1, 32>}, {transform_indices = @transform_16, window_bounds = array<i64: 1, 8, 32>}]} {
    %c0 = arith.constant 0 : index
    %c0_0 = arith.constant 0 : index
    %c0_1 = arith.constant 0 : index
    %0 = vector.load %arg1[%c0, %c0_0, %c0_1] : memref<1x8x32xbf16, #tpu.memory_space<vmem>>, vector<1x8x32xbf16>
    %1 = vector.shape_cast %0 : vector<1x8x32xbf16> to vector<8x32xbf16>
    %2 = arith.extf %1 : vector<8x32xbf16> to vector<8x32xf32>
    %c0_2 = arith.constant 0 : index
    %c0_3 = arith.constant 0 : index
    %c0_4 = arith.constant 0 : index
    %3 = vector.load %arg2[%c0_2, %c0_3, %c0_4] : memref<1x1x8xf32, #tpu.memory_space<vmem>>, vector<1x1x8xf32>
    %4 = vector.shape_cast %3 : vector<1x1x8xf32> to vector<1x8xf32>
    %5 = arith.truncf %2 : vector<8x32xf32> to vector<8x32xbf16>
    %c0_5 = arith.constant 0 : index
    %c0_6 = arith.constant 0 : index
    %6 = vector.load %arg3[%c0_5, %c0_6] : memref<32x96xbf16, #tpu.memory_space<vmem>>, vector<32x96xbf16>
    %cst = arith.constant dense<0.000000e+00> : vector<8x96xf32>
    %7 = tpu.matmul %5, %6, %cst {dimension_numbers = #tpu.dot_dimension_numbers<[1], [0], [0], [1], [0, 0, 1, 1], [], []>} : vector<8x32xbf16>, vector<32x96xbf16>, vector<8x96xf32> -> vector<8x96xf32>
    %c0_7 = arith.constant 0 : index
    %c0_8 = arith.constant 0 : index
    %8 = vector.load %arg4[%c0_7, %c0_8] : memref<1x96xf32, #tpu.memory_space<vmem>>, vector<1x96xf32>
    %9 = vector.broadcast %8 : vector<1x96xf32> to vector<8x96xf32>
    %10 = arith.addf %7, %9 : vector<8x96xf32>
    %c0_9 = arith.constant 0 : index
    %c0_10 = arith.constant 0 : index
    %11 = vector.load %arg18[%c0_9, %c0_10] : memref<8x96xf32, #tpu.memory_space<vmem>>, vector<8x96xf32>
    tpu.vector_store %arg18[%c0_9, %c0_10], %10 {strides = array<i32>} : memref<8x96xf32, #tpu.memory_space<vmem>>, vector<8x96xf32>,
    %c0_11 = arith.constant 0 : index
    %c0_12 = arith.constant 0 : index
    %12 = vector.load %arg18[%c0_11, %c0_12] : memref<8x96xf32, #tpu.memory_space<vmem>>, vector<8x16xf32>
    %13 = arith.truncf %12 : vector<8x16xf32> to vector<8x16xbf16>
    %c0_13 = arith.constant 0 : index
    %c32 = arith.constant 32 : index
    %14 = vector.load %arg18[%c0_13, %c32] : memref<8x96xf32, #tpu.memory_space<vmem>>, vector<8x16xf32>
    %15 = arith.truncf %14 : vector<8x16xf32> to vector<8x16xbf16>
    %c0_14 = arith.constant 0 : index
    %c64 = arith.constant 64 : index
    %16 = vector.load %arg18[%c0_14, %c64] : memref<8x96xf32, #tpu.memory_space<vmem>>, vector<8x16xf32>
    %17 = arith.truncf %16 : vector<8x16xf32> to vector<8x16xbf16>
    %cst_15 = arith.constant dense<0.000000e+00> : vector<8x8xf32>
    %18 = tpu.matmul %13, %15, %cst_15 {dimension_numbers = #tpu.dot_dimension_numbers<[1], [1], [0], [0], [0, 0, 1, 0], [], []>} : vector<8x16xbf16>, vector<8x16xbf16>, vector<8x8xf32> -> vector<8x8xf32>
    %19 = vector.broadcast %4 : vector<1x8xf32> to vector<8x8xf32>
    %20 = arith.addf %18, %19 : vector<8x8xf32>
    %cst_16 = arith.constant dense<0xFF800000> : vector<8xf32>
    %21 = vector.multi_reduction <maximumf>, %20, %cst_16 [1] : vector<8x8xf32> to vector<8xf32>
    %22 = vector.shape_cast %21 : vector<8xf32> to vector<8x1xf32>
    %23 = vector.broadcast %22 : vector<8x1xf32> to vector<8x8xf32>
    %24 = arith.subf %20, %23 : vector<8x8xf32>
    %25 = math.exp %24 : vector<8x8xf32>
    %cst_17 = arith.constant dense<0.000000e+00> : vector<8xf32>
    %26 = vector.multi_reduction <add>, %25, %cst_17 [1] : vector<8x8xf32> to vector<8xf32>
    %27 = vector.shape_cast %26 : vector<8xf32> to vector<8x1xf32>
    %28 = tpu.reciprocal %27 {approx = true} : vector<8x1xf32> -> vector<8x1xf32>
    %29 = vector.broadcast %28 : vector<8x1xf32> to vector<8x8xf32>
    %30 = arith.mulf %25, %29 : vector<8x8xf32>
    %31 = arith.truncf %30 : vector<8x8xf32> to vector<8x8xbf16>
    %cst_18 = arith.constant dense<0.000000e+00> : vector<8x16xf32>
    %32 = tpu.matmul %31, %17, %cst_18 {dimension_numbers = #tpu.dot_dimension_numbers<[1], [0], [0], [1], [0, 0, 1, 1], [], []>} : vector<8x8xbf16>, vector<8x16xbf16>, vector<8x16xf32> -> vector<8x16xf32>
    %c0_19 = arith.constant 0 : index
    %c0_20 = arith.constant 0 : index
    %33 = vector.load %arg19[%c0_19, %c0_20] : memref<8x32xf32, #tpu.memory_space<vmem>>, vector<8x16xf32>
    tpu.vector_store %arg19[%c0_19, %c0_20], %32 {strides = array<i32>} : memref<8x32xf32, #tpu.memory_space<vmem>>, vector<8x16xf32>,
    %c0_21 = arith.constant 0 : index
    %c16 = arith.constant 16 : index
    %34 = vector.load %arg18[%c0_21, %c16] : memref<8x96xf32, #tpu.memory_space<vmem>>, vector<8x16xf32>
    %35 = arith.truncf %34 : vector<8x16xf32> to vector<8x16xbf16>
    %c0_22 = arith.constant 0 : index
    %c48 = arith.constant 48 : index
    %36 = vector.load %arg18[%c0_22, %c48] : memref<8x96xf32, #tpu.memory_space<vmem>>, vector<8x16xf32>
    %37 = arith.truncf %36 : vector<8x16xf32> to vector<8x16xbf16>
    %c0_23 = arith.constant 0 : index
    %c80 = arith.constant 80 : index
    %38 = vector.load %arg18[%c0_23, %c80] : memref<8x96xf32, #tpu.memory_space<vmem>>, vector<8x16xf32>
    %39 = arith.truncf %38 : vector<8x16xf32> to vector<8x16xbf16>
    %cst_24 = arith.constant dense<0.000000e+00> : vector<8x8xf32>
    %40 = tpu.matmul %35, %37, %cst_24 {dimension_numbers = #tpu.dot_dimension_numbers<[1], [1], [0], [0], [0, 0, 1, 0], [], []>} : vector<8x16xbf16>, vector<8x16xbf16>, vector<8x8xf32> -> vector<8x8xf32>
    %41 = vector.broadcast %4 : vector<1x8xf32> to vector<8x8xf32>
    %42 = arith.addf %40, %41 : vector<8x8xf32>
    %cst_25 = arith.constant dense<0xFF800000> : vector<8xf32>
    %43 = vector.multi_reduction <maximumf>, %42, %cst_25 [1] : vector<8x8xf32> to vector<8xf32>
    %44 = vector.shape_cast %43 : vector<8xf32> to vector<8x1xf32>
    %45 = vector.broadcast %44 : vector<8x1xf32> to vector<8x8xf32>
    %46 = arith.subf %42, %45 : vector<8x8xf32>
    %47 = math.exp %46 : vector<8x8xf32>
    %cst_26 = arith.constant dense<0.000000e+00> : vector<8xf32>
    %48 = vector.multi_reduction <add>, %47, %cst_26 [1] : vector<8x8xf32> to vector<8xf32>
    %49 = vector.shape_cast %48 : vector<8xf32> to vector<8x1xf32>
    %50 = tpu.reciprocal %49 {approx = true} : vector<8x1xf32> -> vector<8x1xf32>
    %51 = vector.broadcast %50 : vector<8x1xf32> to vector<8x8xf32>
    %52 = arith.mulf %47, %51 : vector<8x8xf32>
    %53 = arith.truncf %52 : vector<8x8xf32> to vector<8x8xbf16>
    %cst_27 = arith.constant dense<0.000000e+00> : vector<8x16xf32>
    %54 = tpu.matmul %53, %39, %cst_27 {dimension_numbers = #tpu.dot_dimension_numbers<[1], [0], [0], [1], [0, 0, 1, 1], [], []>} : vector<8x8xbf16>, vector<8x16xbf16>, vector<8x16xf32> -> vector<8x16xf32>
    %c0_28 = arith.constant 0 : index
    %c16_29 = arith.constant 16 : index
    %55 = vector.load %arg19[%c0_28, %c16_29] : memref<8x32xf32, #tpu.memory_space<vmem>>, vector<8x16xf32>
    tpu.vector_store %arg19[%c0_28, %c16_29], %54 {strides = array<i32>} : memref<8x32xf32, #tpu.memory_space<vmem>>, vector<8x16xf32>,
    %c0_30 = arith.constant 0 : index
    %c0_31 = arith.constant 0 : index
    %56 = vector.load %arg19[%c0_30, %c0_31] : memref<8x32xf32, #tpu.memory_space<vmem>>, vector<8x32xf32>
    %57 = arith.truncf %56 : vector<8x32xf32> to vector<8x32xbf16>
    %c0_32 = arith.constant 0 : index
    %c0_33 = arith.constant 0 : index
    %58 = vector.load %arg5[%c0_32, %c0_33] : memref<32x32xbf16, #tpu.memory_space<vmem>>, vector<32x32xbf16>
    %cst_34 = arith.constant dense<0.000000e+00> : vector<8x32xf32>
    %59 = tpu.matmul %57, %58, %cst_34 {dimension_numbers = #tpu.dot_dimension_numbers<[1], [0], [0], [1], [0, 0, 1, 1], [], []>} : vector<8x32xbf16>, vector<32x32xbf16>, vector<8x32xf32> -> vector<8x32xf32>
    %c0_35 = arith.constant 0 : index
    %c0_36 = arith.constant 0 : index
    %60 = vector.load %arg6[%c0_35, %c0_36] : memref<1x32xf32, #tpu.memory_space<vmem>>, vector<1x32xf32>
    %61 = vector.broadcast %60 : vector<1x32xf32> to vector<8x32xf32>
    %62 = arith.addf %59, %61 : vector<8x32xf32>
    %63 = arith.addf %62, %2 : vector<8x32xf32>
    %c0_37 = arith.constant 0 : index
    %c0_38 = arith.constant 0 : index
    %64 = vector.load %arg7[%c0_37, %c0_38] : memref<1x32xf32, #tpu.memory_space<vmem>>, vector<1x32xf32>
    %c0_39 = arith.constant 0 : index
    %c0_40 = arith.constant 0 : index
    %65 = vector.load %arg8[%c0_39, %c0_40] : memref<1x32xf32, #tpu.memory_space<vmem>>, vector<1x32xf32>
    %cst_41 = arith.constant dense<0.000000e+00> : vector<8xf32>
    %66 = vector.multi_reduction <add>, %63, %cst_41 [1] : vector<8x32xf32> to vector<8xf32>
    %67 = vector.shape_cast %66 : vector<8xf32> to vector<8x1xf32>
    %cst_42 = arith.constant 3.200000e+01 : f32
    %68 = vector.broadcast %cst_42 : f32 to vector<8x1xf32>
    %69 = arith.divf %67, %68 : vector<8x1xf32>
    %70 = arith.mulf %63, %63 : vector<8x32xf32>
    %cst_43 = arith.constant dense<0.000000e+00> : vector<8xf32>
    %71 = vector.multi_reduction <add>, %70, %cst_43 [1] : vector<8x32xf32> to vector<8xf32>
    %72 = vector.shape_cast %71 : vector<8xf32> to vector<8x1xf32>
    %cst_44 = arith.constant 3.200000e+01 : f32
    %73 = vector.broadcast %cst_44 : f32 to vector<8x1xf32>
    %74 = arith.divf %72, %73 : vector<8x1xf32>
    %75 = arith.mulf %69, %69 : vector<8x1xf32>
    %76 = arith.subf %74, %75 : vector<8x1xf32>
    %77 = vector.broadcast %69 : vector<8x1xf32> to vector<8x32xf32>
    %78 = arith.subf %63, %77 : vector<8x32xf32>
    %cst_45 = arith.constant 9.99999996E-13 : f32
    %79 = vector.broadcast %cst_45 : f32 to vector<8x1xf32>
    %80 = arith.addf %76, %79 : vector<8x1xf32>
    %81 = math.rsqrt %80 : vector<8x1xf32>
    %82 = vector.broadcast %81 : vector<8x1xf32> to vector<8x32xf32>
    %83 = arith.mulf %78, %82 : vector<8x32xf32>
    %84 = vector.broadcast %64 : vector<1x32xf32> to vector<8x32xf32>
    %85 = arith.mulf %83, %84 : vector<8x32xf32>
    %86 = vector.broadcast %65 : vector<1x32xf32> to vector<8x32xf32>
    %87 = arith.addf %85, %86 : vector<8x32xf32>
    %88 = arith.truncf %87 : vector<8x32xf32> to vector<8x32xbf16>
    %c0_46 = arith.constant 0 : index
    %c0_47 = arith.constant 0 : index
    %89 = vector.load %arg9[%c0_46, %c0_47] : memref<32x64xbf16, #tpu.memory_space<vmem>>, vector<32x64xbf16>
    %cst_48 = arith.constant dense<0.000000e+00> : vector<8x64xf32>
    %90 = tpu.matmul %88, %89, %cst_48 {dimension_numbers = #tpu.dot_dimension_numbers<[1], [0], [0], [1], [0, 0, 1, 1], [], []>} : vector<8x32xbf16>, vector<32x64xbf16>, vector<8x64xf32> -> vector<8x64xf32>
    %c0_49 = arith.constant 0 : index
    %c0_50 = arith.constant 0 : index
    %91 = vector.load %arg10[%c0_49, %c0_50] : memref<1x64xf32, #tpu.memory_space<vmem>>, vector<1x64xf32>
    %92 = vector.broadcast %91 : vector<1x64xf32> to vector<8x64xf32>
    %93 = arith.addf %90, %92 : vector<8x64xf32>
    %94 = arith.mulf %93, %93 : vector<8x64xf32>
    %95 = arith.mulf %93, %94 : vector<8x64xf32>
    %cst_51 = arith.constant 4.471500e-02 : f32
    %96 = vector.broadcast %cst_51 : f32 to vector<8x64xf32>
    %97 = arith.mulf %96, %95 : vector<8x64xf32>
    %98 = arith.addf %93, %97 : vector<8x64xf32>
    %cst_52 = arith.constant 0.797884583 : f32
    %99 = vector.broadcast %cst_52 : f32 to vector<8x64xf32>
    %100 = arith.mulf %99, %98 : vector<8x64xf32>
    %101 = math.tanh %100 : vector<8x64xf32>
    %cst_53 = arith.constant 1.000000e+00 : f32
    %102 = vector.broadcast %cst_53 : f32 to vector<8x64xf32>
    %103 = arith.addf %102, %101 : vector<8x64xf32>
    %cst_54 = arith.constant 5.000000e-01 : f32
    %104 = vector.broadcast %cst_54 : f32 to vector<8x64xf32>
    %105 = arith.mulf %104, %103 : vector<8x64xf32>
    %106 = arith.mulf %93, %105 : vector<8x64xf32>
    %107 = arith.truncf %106 : vector<8x64xf32> to vector<8x64xbf16>
    %c0_55 = arith.constant 0 : index
    %c0_56 = arith.constant 0 : index
    %108 = vector.load %arg11[%c0_55, %c0_56] : memref<64x32xbf16, #tpu.memory_space<vmem>>, vector<64x32xbf16>
    %cst_57 = arith.constant dense<0.000000e+00> : vector<8x32xf32>
    %109 = tpu.matmul %107, %108, %cst_57 {dimension_numbers = #tpu.dot_dimension_numbers<[1], [0], [0], [1], [0, 0, 1, 1], [], []>} : vector<8x64xbf16>, vector<64x32xbf16>, vector<8x32xf32> -> vector<8x32xf32>
    %c0_58 = arith.constant 0 : index
    %c0_59 = arith.constant 0 : index
    %110 = vector.load %arg12[%c0_58, %c0_59] : memref<1x32xf32, #tpu.memory_space<vmem>>, vector<1x32xf32>
    %111 = vector.broadcast %110 : vector<1x32xf32> to vector<8x32xf32>
    %112 = arith.addf %109, %111 : vector<8x32xf32>
    %113 = arith.addf %112, %87 : vector<8x32xf32>
    %c0_60 = arith.constant 0 : index
    %c0_61 = arith.constant 0 : index
    %114 = vector.load %arg13[%c0_60, %c0_61] : memref<1x32xf32, #tpu.memory_space<vmem>>, vector<1x32xf32>
    %c0_62 = arith.constant 0 : index
    %c0_63 = arith.constant 0 : index
    %115 = vector.load %arg14[%c0_62, %c0_63] : memref<1x32xf32, #tpu.memory_space<vmem>>, vector<1x32xf32>
    %cst_64 = arith.constant dense<0.000000e+00> : vector<8xf32>
    %116 = vector.multi_reduction <add>, %113, %cst_64 [1] : vector<8x32xf32> to vector<8xf32>
    %117 = vector.shape_cast %116 : vector<8xf32> to vector<8x1xf32>
    %cst_65 = arith.constant 3.200000e+01 : f32
    %118 = vector.broadcast %cst_65 : f32 to vector<8x1xf32>
    %119 = arith.divf %117, %118 : vector<8x1xf32>
    %120 = arith.mulf %113, %113 : vector<8x32xf32>
    %cst_66 = arith.constant dense<0.000000e+00> : vector<8xf32>
    %121 = vector.multi_reduction <add>, %120, %cst_66 [1] : vector<8x32xf32> to vector<8xf32>
    %122 = vector.shape_cast %121 : vector<8xf32> to vector<8x1xf32>
    %cst_67 = arith.constant 3.200000e+01 : f32
    %123 = vector.broadcast %cst_67 : f32 to vector<8x1xf32>
    %124 = arith.divf %122, %123 : vector<8x1xf32>
    %125 = arith.mulf %119, %119 : vector<8x1xf32>
    %126 = arith.subf %124, %125 : vector<8x1xf32>
    %127 = vector.broadcast %119 : vector<8x1xf32> to vector<8x32xf32>
    %128 = arith.subf %113, %127 : vector<8x32xf32>
    %cst_68 = arith.constant 9.99999996E-13 : f32
    %129 = vector.broadcast %cst_68 : f32 to vector<8x1xf32>
    %130 = arith.addf %126, %129 : vector<8x1xf32>
    %131 = math.rsqrt %130 : vector<8x1xf32>
    %132 = vector.broadcast %131 : vector<8x1xf32> to vector<8x32xf32>
    %133 = arith.mulf %128, %132 : vector<8x32xf32>
    %134 = vector.broadcast %114 : vector<1x32xf32> to vector<8x32xf32>
    %135 = arith.mulf %133, %134 : vector<8x32xf32>
    %136 = vector.broadcast %115 : vector<1x32xf32> to vector<8x32xf32>
    %137 = arith.addf %135, %136 : vector<8x32xf32>
    %138 = arith.truncf %137 : vector<8x32xf32> to vector<8x32xbf16>
    %c0_69 = arith.constant 0 : index
    %c0_70 = arith.constant 0 : index
    %c0_71 = arith.constant 0 : index
    %139 = vector.load %arg17[%c0_69, %c0_70, %c0_71] : memref<1x8x32xbf16, #tpu.memory_space<vmem>>, vector<1x8x32xbf16>
    %140 = vector.shape_cast %139 : vector<1x8x32xbf16> to vector<8x32xbf16>
    %141 = vector.shape_cast %138 : vector<8x32xbf16> to vector<1x8x32xbf16>
    tpu.vector_store %arg17[%c0_69, %c0_70, %c0_71], %141 {strides = array<i32>} : memref<1x8x32xbf16, #tpu.memory_space<vmem>>, vector<1x8x32xbf16>,
    return
  }
  func.func @transform_0(%arg0: i32) -> (i32, i32, i32) {
    %c0_i32 = arith.constant 0 : i32
    %c0_i32_0 = arith.constant 0 : i32
    %c0_i32_1 = arith.constant 0 : i32
    return %arg0, %c0_i32, %c0_i32_0 : i32, i32, i32
  }
  func.func @transform_1(%arg0: i32) -> (i32, i32, i32) {
    %c0_i32 = arith.constant 0 : i32
    %c0_i32_0 = arith.constant 0 : i32
    %c0_i32_1 = arith.constant 0 : i32
    return %arg0, %c0_i32, %c0_i32_0 : i32, i32, i32
  }
  func.func @transform_2(%arg0: i32) -> (i32, i32) {
    %c0_i32 = arith.constant 0 : i32
    %c0_i32_0 = arith.constant 0 : i32
    %c0_i32_1 = arith.constant 0 : i32
    return %c0_i32, %c0_i32_0 : i32, i32
  }
  func.func @transform_3(%arg0: i32) -> (i32, i32) {
    %c0_i32 = arith.constant 0 : i32
    %c0_i32_0 = arith.constant 0 : i32
    %c0_i32_1 = arith.constant 0 : i32
    return %c0_i32, %c0_i32_0 : i32, i32
  }
  func.func @transform_4(%arg0: i32) -> (i32, i32) {
    %c0_i32 = arith.constant 0 : i32
    %c0_i32_0 = arith.constant 0 : i32
    %c0_i32_1 = arith.constant 0 : i32
    return %c0_i32, %c0_i32_0 : i32, i32
  }
  func.func @transform_5(%arg0: i32) -> (i32, i32) {
    %c0_i32 = arith.constant 0 : i32
    %c0_i32_0 = arith.constant 0 : i32
    %c0_i32_1 = arith.constant 0 : i32
    return %c0_i32, %c0_i32_0 : i32, i32
  }
  func.func @transform_6(%arg0: i32) -> (i32, i32) {
    %c0_i32 = arith.constant 0 : i32
    %c0_i32_0 = arith.constant 0 : i32
    %c0_i32_1 = arith.constant 0 : i32
    return %c0_i32, %c0_i32_0 : i32, i32
  }
  func.func @transform_7(%arg0: i32) -> (i32, i32) {
    %c0_i32 = arith.constant 0 : i32
    %c0_i32_0 = arith.constant 0 : i32
    %c0_i32_1 = arith.constant 0 : i32
    return %c0_i32, %c0_i32_0 : i32, i32
  }
  func.func @transform_8(%arg0: i32) -> (i32, i32) {
    %c0_i32 = arith.constant 0 : i32
    %c0_i32_0 = arith.constant 0 : i32
    %c0_i32_1 = arith.constant 0 : i32
    return %c0_i32, %c0_i32_0 : i32, i32
  }
  func.func @transform_9(%arg0: i32) -> (i32, i32) {
    %c0_i32 = arith.constant 0 : i32
    %c0_i32_0 = arith.constant 0 : i32
    %c0_i32_1 = arith.constant 0 : i32
    return %c0_i32, %c0_i32_0 : i32, i32
  }
  func.func @transform_10(%arg0: i32) -> (i32, i32) {
    %c0_i32 = arith.constant 0 : i32
    %c0_i32_0 = arith.constant 0 : i32
    %c0_i32_1 = arith.constant 0 : i32
    return %c0_i32, %c0_i32_0 : i32, i32
  }
  func.func @transform_11(%arg0: i32) -> (i32, i32) {
    %c0_i32 = arith.constant 0 : i32
    %c0_i32_0 = arith.constant 0 : i32
    %c0_i32_1 = arith.constant 0 : i32
    return %c0_i32, %c0_i32_0 : i32, i32
  }
  func.func @transform_12(%arg0: i32) -> (i32, i32) {
    %c0_i32 = arith.constant 0 : i32
    %c0_i32_0 = arith.constant 0 : i32
    %c0_i32_1 = arith.constant 0 : i32
    return %c0_i32, %c0_i32_0 : i32, i32
  }
  func.func @transform_13(%arg0: i32) -> (i32, i32) {
    %c0_i32 = arith.constant 0 : i32
    %c0_i32_0 = arith.constant 0 : i32
    %c0_i32_1 = arith.constant 0 : i32
    return %c0_i32, %c0_i32_0 : i32, i32
  }
  func.func @transform_14(%arg0: i32) -> (i32, i32) {
    %c0_i32 = arith.constant 0 : i32
    %c0_i32_0 = arith.constant 0 : i32
    %c0_i32_1 = arith.constant 0 : i32
    return %c0_i32, %c0_i32_0 : i32, i32
  }
  func.func @transform_15(%arg0: i32) -> (i32, i32) {
    %c0_i32 = arith.constant 0 : i32
    %c0_i32_0 = arith.constant 0 : i32
    %c0_i32_1 = arith.constant 0 : i32
    return %c0_i32, %c0_i32_0 : i32, i32
  }
  func.func @transform_16(%arg0: i32) -> (i32, i32, i32) {
    %c0_i32 = arith.constant 0 : i32
    %c0_i32_0 = arith.constant 0 : i32
    %c0_i32_1 = arith.constant 0 : i32
    return %arg0, %c0_i32, %c0_i32_0 : i32, i32, i32
  }
}

module attributes {stable_mosaic.version = 11 : i64} {
  func.func @_encoder_layer_kernel(%arg0: i32, %arg1: memref<1x8x32xbf16, #tpu.memory_space<vmem>>, %arg2: memref<1x1x8xf32, #tpu.memory_space<vmem>>, %arg3: memref<32x96xbf16, #tpu.memory_space<vmem>>, %arg4: memref<1x96xf32, #tpu.memory_space<vmem>>, %arg5: memref<32x32xbf16, #tpu.memory_space<vmem>>, %arg6: memref<1x32xf32, #tpu.memory_space<vmem>>, %arg7: memref<1x32xf32, #tpu.memory_space<vmem>>, %arg8: memref<1x32xf32, #tpu.memory_space<vmem>>, %arg9: memref<32x64xbf16, #tpu.memory_space<vmem>>, %arg10: memref<1x64xf32, #tpu.memory_space<vmem>>, %arg11: memref<64x32xbf16, #tpu.memory_space<vmem>>, %arg12: memref<1x32xf32, #tpu.memory_space<vmem>>, %arg13: memref<1x32xf32, #tpu.memory_space<vmem>>, %arg14: memref<1x32xf32, #tpu.memory_space<vmem>>, %arg15: memref<1x32xf32, #tpu.memory_space<vmem>>, %arg16: memref<1x32xf32, #tpu.memory_space<vmem>>, %arg17: memref<1x8x32xbf16, #tpu.memory_space<vmem>>, %arg18: memref<8x96xf32, #tpu.memory_space<vmem>>, %arg19: memref<8x32xf32, #tpu.memory_space<vmem>>) attributes {dimension_semantics = [#tpu.dimension_semantics<parallel>], iteration_bounds = array<i64: 2>, scalar_prefetch = 0 : i64, scratch_operands = 2 : i64, tpu.core_type = #tpu.core_type<tc>, window_params = [{transform_indices = @transform_0, window_bounds = array<i64: 1, 8, 32>}, {transform_indices = @transform_1, window_bounds = array<i64: 1, 1, 8>}, {pipeline_mode = #tpu.pipeline_mode<synchronous>, transform_indices = @transform_2, window_bounds = array<i64: 32, 96>}, {pipeline_mode = #tpu.pipeline_mode<synchronous>, transform_indices = @transform_3, window_bounds = array<i64: 1, 96>}, {pipeline_mode = #tpu.pipeline_mode<synchronous>, transform_indices = @transform_4, window_bounds = array<i64: 32, 32>}, {pipeline_mode = #tpu.pipeline_mode<synchronous>, transform_indices = @transform_5, window_bounds = array<i64: 1, 32>}, {pipeline_mode = #tpu.pipeline_mode<synchronous>, transform_indices = @transform_6, window_bounds = array<i64: 1, 32>}, {pipeline_mode = #tpu.pipeline_mode<synchronous>, transform_indices = @transform_7, window_bounds = array<i64: 1, 32>}, {pipeline_mode = #tpu.pipeline_mode<synchronous>, transform_indices = @transform_8, window_bounds = array<i64: 32, 64>}, {pipeline_mode = #tpu.pipeline_mode<synchronous>, transform_indices = @transform_9, window_bounds = array<i64: 1, 64>}, {pipeline_mode = #tpu.pipeline_mode<synchronous>, transform_indices = @transform_10, window_bounds = array<i64: 64, 32>}, {pipeline_mode = #tpu.pipeline_mode<synchronous>, transform_indices = @transform_11, window_bounds = array<i64: 1, 32>}, {pipeline_mode = #tpu.pipeline_mode<synchronous>, transform_indices = @transform_12, window_bounds = array<i64: 1, 32>}, {pipeline_mode = #tpu.pipeline_mode<synchronous>, transform_indices = @transform_13, window_bounds = array<i64: 1, 32>}, {pipeline_mode = #tpu.pipeline_mode<synchronous>, transform_indices = @transform_14, window_bounds = array<i64: 1, 32>}, {pipeline_mode = #tpu.pipeline_mode<synchronous>, transform_indices = @transform_15, window_bounds = array<i64: 1, 32>}, {transform_indices = @transform_16, window_bounds = array<i64: 1, 8, 32>}]} {
    %c0 = arith.constant 0 : index
    %c0_0 = arith.constant 0 : index
    %c0_1 = arith.constant 0 : index
    %0 = vector.load %arg1[%c0, %c0_0, %c0_1] : memref<1x8x32xbf16, #tpu.memory_space<vmem>>, vector<1x8x32xbf16>
    %1 = vector.shape_cast %0 : vector<1x8x32xbf16> to vector<8x32xbf16>
    %2 = arith.extf %1 : vector<8x32xbf16> to vector<8x32xf32>
    %c0_2 = arith.constant 0 : index
    %c0_3 = arith.constant 0 : index
    %3 = vector.load %arg15[%c0_2, %c0_3] : memref<1x32xf32, #tpu.memory_space<vmem>>, vector<1x32xf32>
    %c0_4 = arith.constant 0 : index
    %c0_5 = arith.constant 0 : index
    %4 = vector.load %arg16[%c0_4, %c0_5] : memref<1x32xf32, #tpu.memory_space<vmem>>, vector<1x32xf32>
    %cst = arith.constant dense<0.000000e+00> : vector<8xf32>
    %5 = vector.multi_reduction <add>, %2, %cst [1] : vector<8x32xf32> to vector<8xf32>
    %6 = vector.shape_cast %5 : vector<8xf32> to vector<8x1xf32>
    %cst_6 = arith.constant 3.200000e+01 : f32
    %7 = vector.broadcast %cst_6 : f32 to vector<8x1xf32>
    %8 = arith.divf %6, %7 : vector<8x1xf32>
    %9 = arith.mulf %2, %2 : vector<8x32xf32>
    %cst_7 = arith.constant dense<0.000000e+00> : vector<8xf32>
    %10 = vector.multi_reduction <add>, %9, %cst_7 [1] : vector<8x32xf32> to vector<8xf32>
    %11 = vector.shape_cast %10 : vector<8xf32> to vector<8x1xf32>
    %cst_8 = arith.constant 3.200000e+01 : f32
    %12 = vector.broadcast %cst_8 : f32 to vector<8x1xf32>
    %13 = arith.divf %11, %12 : vector<8x1xf32>
    %14 = arith.mulf %8, %8 : vector<8x1xf32>
    %15 = arith.subf %13, %14 : vector<8x1xf32>
    %16 = vector.broadcast %8 : vector<8x1xf32> to vector<8x32xf32>
    %17 = arith.subf %2, %16 : vector<8x32xf32>
    %cst_9 = arith.constant 9.99999996E-13 : f32
    %18 = vector.broadcast %cst_9 : f32 to vector<8x1xf32>
    %19 = arith.addf %15, %18 : vector<8x1xf32>
    %20 = math.rsqrt %19 : vector<8x1xf32>
    %21 = vector.broadcast %20 : vector<8x1xf32> to vector<8x32xf32>
    %22 = arith.mulf %17, %21 : vector<8x32xf32>
    %23 = vector.broadcast %3 : vector<1x32xf32> to vector<8x32xf32>
    %24 = arith.mulf %22, %23 : vector<8x32xf32>
    %25 = vector.broadcast %4 : vector<1x32xf32> to vector<8x32xf32>
    %26 = arith.addf %24, %25 : vector<8x32xf32>
    %c0_10 = arith.constant 0 : index
    %c0_11 = arith.constant 0 : index
    %c0_12 = arith.constant 0 : index
    %27 = vector.load %arg2[%c0_10, %c0_11, %c0_12] : memref<1x1x8xf32, #tpu.memory_space<vmem>>, vector<1x1x8xf32>
    %28 = vector.shape_cast %27 : vector<1x1x8xf32> to vector<1x8xf32>
    %29 = arith.truncf %26 : vector<8x32xf32> to vector<8x32xbf16>
    %c0_13 = arith.constant 0 : index
    %c0_14 = arith.constant 0 : index
    %30 = vector.load %arg3[%c0_13, %c0_14] : memref<32x96xbf16, #tpu.memory_space<vmem>>, vector<32x96xbf16>
    %cst_15 = arith.constant dense<0.000000e+00> : vector<8x96xf32>
    %31 = tpu.matmul %29, %30, %cst_15 {dimension_numbers = #tpu.dot_dimension_numbers<[1], [0], [0], [1], [0, 0, 1, 1], [], []>} : vector<8x32xbf16>, vector<32x96xbf16>, vector<8x96xf32> -> vector<8x96xf32>
    %c0_16 = arith.constant 0 : index
    %c0_17 = arith.constant 0 : index
    %32 = vector.load %arg4[%c0_16, %c0_17] : memref<1x96xf32, #tpu.memory_space<vmem>>, vector<1x96xf32>
    %33 = vector.broadcast %32 : vector<1x96xf32> to vector<8x96xf32>
    %34 = arith.addf %31, %33 : vector<8x96xf32>
    %c0_18 = arith.constant 0 : index
    %c0_19 = arith.constant 0 : index
    %35 = vector.load %arg18[%c0_18, %c0_19] : memref<8x96xf32, #tpu.memory_space<vmem>>, vector<8x96xf32>
    tpu.vector_store %arg18[%c0_18, %c0_19], %34 {strides = array<i32>} : memref<8x96xf32, #tpu.memory_space<vmem>>, vector<8x96xf32>,
    %c0_20 = arith.constant 0 : index
    %c0_21 = arith.constant 0 : index
    %36 = vector.load %arg18[%c0_20, %c0_21] : memref<8x96xf32, #tpu.memory_space<vmem>>, vector<8x16xf32>
    %37 = arith.truncf %36 : vector<8x16xf32> to vector<8x16xbf16>
    %c0_22 = arith.constant 0 : index
    %c32 = arith.constant 32 : index
    %38 = vector.load %arg18[%c0_22, %c32] : memref<8x96xf32, #tpu.memory_space<vmem>>, vector<8x16xf32>
    %39 = arith.truncf %38 : vector<8x16xf32> to vector<8x16xbf16>
    %c0_23 = arith.constant 0 : index
    %c64 = arith.constant 64 : index
    %40 = vector.load %arg18[%c0_23, %c64] : memref<8x96xf32, #tpu.memory_space<vmem>>, vector<8x16xf32>
    %41 = arith.truncf %40 : vector<8x16xf32> to vector<8x16xbf16>
    %cst_24 = arith.constant dense<0.000000e+00> : vector<8x8xf32>
    %42 = tpu.matmul %37, %39, %cst_24 {dimension_numbers = #tpu.dot_dimension_numbers<[1], [1], [0], [0], [0, 0, 1, 0], [], []>} : vector<8x16xbf16>, vector<8x16xbf16>, vector<8x8xf32> -> vector<8x8xf32>
    %43 = vector.broadcast %28 : vector<1x8xf32> to vector<8x8xf32>
    %44 = arith.addf %42, %43 : vector<8x8xf32>
    %cst_25 = arith.constant dense<0xFF800000> : vector<8xf32>
    %45 = vector.multi_reduction <maximumf>, %44, %cst_25 [1] : vector<8x8xf32> to vector<8xf32>
    %46 = vector.shape_cast %45 : vector<8xf32> to vector<8x1xf32>
    %47 = vector.broadcast %46 : vector<8x1xf32> to vector<8x8xf32>
    %48 = arith.subf %44, %47 : vector<8x8xf32>
    %49 = math.exp %48 : vector<8x8xf32>
    %cst_26 = arith.constant dense<0.000000e+00> : vector<8xf32>
    %50 = vector.multi_reduction <add>, %49, %cst_26 [1] : vector<8x8xf32> to vector<8xf32>
    %51 = vector.shape_cast %50 : vector<8xf32> to vector<8x1xf32>
    %52 = tpu.reciprocal %51 {approx = true} : vector<8x1xf32> -> vector<8x1xf32>
    %53 = vector.broadcast %52 : vector<8x1xf32> to vector<8x8xf32>
    %54 = arith.mulf %49, %53 : vector<8x8xf32>
    %55 = arith.truncf %54 : vector<8x8xf32> to vector<8x8xbf16>
    %cst_27 = arith.constant dense<0.000000e+00> : vector<8x16xf32>
    %56 = tpu.matmul %55, %41, %cst_27 {dimension_numbers = #tpu.dot_dimension_numbers<[1], [0], [0], [1], [0, 0, 1, 1], [], []>} : vector<8x8xbf16>, vector<8x16xbf16>, vector<8x16xf32> -> vector<8x16xf32>
    %c0_28 = arith.constant 0 : index
    %c0_29 = arith.constant 0 : index
    %57 = vector.load %arg19[%c0_28, %c0_29] : memref<8x32xf32, #tpu.memory_space<vmem>>, vector<8x16xf32>
    tpu.vector_store %arg19[%c0_28, %c0_29], %56 {strides = array<i32>} : memref<8x32xf32, #tpu.memory_space<vmem>>, vector<8x16xf32>,
    %c0_30 = arith.constant 0 : index
    %c16 = arith.constant 16 : index
    %58 = vector.load %arg18[%c0_30, %c16] : memref<8x96xf32, #tpu.memory_space<vmem>>, vector<8x16xf32>
    %59 = arith.truncf %58 : vector<8x16xf32> to vector<8x16xbf16>
    %c0_31 = arith.constant 0 : index
    %c48 = arith.constant 48 : index
    %60 = vector.load %arg18[%c0_31, %c48] : memref<8x96xf32, #tpu.memory_space<vmem>>, vector<8x16xf32>
    %61 = arith.truncf %60 : vector<8x16xf32> to vector<8x16xbf16>
    %c0_32 = arith.constant 0 : index
    %c80 = arith.constant 80 : index
    %62 = vector.load %arg18[%c0_32, %c80] : memref<8x96xf32, #tpu.memory_space<vmem>>, vector<8x16xf32>
    %63 = arith.truncf %62 : vector<8x16xf32> to vector<8x16xbf16>
    %cst_33 = arith.constant dense<0.000000e+00> : vector<8x8xf32>
    %64 = tpu.matmul %59, %61, %cst_33 {dimension_numbers = #tpu.dot_dimension_numbers<[1], [1], [0], [0], [0, 0, 1, 0], [], []>} : vector<8x16xbf16>, vector<8x16xbf16>, vector<8x8xf32> -> vector<8x8xf32>
    %65 = vector.broadcast %28 : vector<1x8xf32> to vector<8x8xf32>
    %66 = arith.addf %64, %65 : vector<8x8xf32>
    %cst_34 = arith.constant dense<0xFF800000> : vector<8xf32>
    %67 = vector.multi_reduction <maximumf>, %66, %cst_34 [1] : vector<8x8xf32> to vector<8xf32>
    %68 = vector.shape_cast %67 : vector<8xf32> to vector<8x1xf32>
    %69 = vector.broadcast %68 : vector<8x1xf32> to vector<8x8xf32>
    %70 = arith.subf %66, %69 : vector<8x8xf32>
    %71 = math.exp %70 : vector<8x8xf32>
    %cst_35 = arith.constant dense<0.000000e+00> : vector<8xf32>
    %72 = vector.multi_reduction <add>, %71, %cst_35 [1] : vector<8x8xf32> to vector<8xf32>
    %73 = vector.shape_cast %72 : vector<8xf32> to vector<8x1xf32>
    %74 = tpu.reciprocal %73 {approx = true} : vector<8x1xf32> -> vector<8x1xf32>
    %75 = vector.broadcast %74 : vector<8x1xf32> to vector<8x8xf32>
    %76 = arith.mulf %71, %75 : vector<8x8xf32>
    %77 = arith.truncf %76 : vector<8x8xf32> to vector<8x8xbf16>
    %cst_36 = arith.constant dense<0.000000e+00> : vector<8x16xf32>
    %78 = tpu.matmul %77, %63, %cst_36 {dimension_numbers = #tpu.dot_dimension_numbers<[1], [0], [0], [1], [0, 0, 1, 1], [], []>} : vector<8x8xbf16>, vector<8x16xbf16>, vector<8x16xf32> -> vector<8x16xf32>
    %c0_37 = arith.constant 0 : index
    %c16_38 = arith.constant 16 : index
    %79 = vector.load %arg19[%c0_37, %c16_38] : memref<8x32xf32, #tpu.memory_space<vmem>>, vector<8x16xf32>
    tpu.vector_store %arg19[%c0_37, %c16_38], %78 {strides = array<i32>} : memref<8x32xf32, #tpu.memory_space<vmem>>, vector<8x16xf32>,
    %c0_39 = arith.constant 0 : index
    %c0_40 = arith.constant 0 : index
    %80 = vector.load %arg19[%c0_39, %c0_40] : memref<8x32xf32, #tpu.memory_space<vmem>>, vector<8x32xf32>
    %81 = arith.truncf %80 : vector<8x32xf32> to vector<8x32xbf16>
    %c0_41 = arith.constant 0 : index
    %c0_42 = arith.constant 0 : index
    %82 = vector.load %arg5[%c0_41, %c0_42] : memref<32x32xbf16, #tpu.memory_space<vmem>>, vector<32x32xbf16>
    %cst_43 = arith.constant dense<0.000000e+00> : vector<8x32xf32>
    %83 = tpu.matmul %81, %82, %cst_43 {dimension_numbers = #tpu.dot_dimension_numbers<[1], [0], [0], [1], [0, 0, 1, 1], [], []>} : vector<8x32xbf16>, vector<32x32xbf16>, vector<8x32xf32> -> vector<8x32xf32>
    %c0_44 = arith.constant 0 : index
    %c0_45 = arith.constant 0 : index
    %84 = vector.load %arg6[%c0_44, %c0_45] : memref<1x32xf32, #tpu.memory_space<vmem>>, vector<1x32xf32>
    %85 = vector.broadcast %84 : vector<1x32xf32> to vector<8x32xf32>
    %86 = arith.addf %83, %85 : vector<8x32xf32>
    %87 = arith.addf %86, %26 : vector<8x32xf32>
    %c0_46 = arith.constant 0 : index
    %c0_47 = arith.constant 0 : index
    %88 = vector.load %arg7[%c0_46, %c0_47] : memref<1x32xf32, #tpu.memory_space<vmem>>, vector<1x32xf32>
    %c0_48 = arith.constant 0 : index
    %c0_49 = arith.constant 0 : index
    %89 = vector.load %arg8[%c0_48, %c0_49] : memref<1x32xf32, #tpu.memory_space<vmem>>, vector<1x32xf32>
    %cst_50 = arith.constant dense<0.000000e+00> : vector<8xf32>
    %90 = vector.multi_reduction <add>, %87, %cst_50 [1] : vector<8x32xf32> to vector<8xf32>
    %91 = vector.shape_cast %90 : vector<8xf32> to vector<8x1xf32>
    %cst_51 = arith.constant 3.200000e+01 : f32
    %92 = vector.broadcast %cst_51 : f32 to vector<8x1xf32>
    %93 = arith.divf %91, %92 : vector<8x1xf32>
    %94 = arith.mulf %87, %87 : vector<8x32xf32>
    %cst_52 = arith.constant dense<0.000000e+00> : vector<8xf32>
    %95 = vector.multi_reduction <add>, %94, %cst_52 [1] : vector<8x32xf32> to vector<8xf32>
    %96 = vector.shape_cast %95 : vector<8xf32> to vector<8x1xf32>
    %cst_53 = arith.constant 3.200000e+01 : f32
    %97 = vector.broadcast %cst_53 : f32 to vector<8x1xf32>
    %98 = arith.divf %96, %97 : vector<8x1xf32>
    %99 = arith.mulf %93, %93 : vector<8x1xf32>
    %100 = arith.subf %98, %99 : vector<8x1xf32>
    %101 = vector.broadcast %93 : vector<8x1xf32> to vector<8x32xf32>
    %102 = arith.subf %87, %101 : vector<8x32xf32>
    %cst_54 = arith.constant 9.99999996E-13 : f32
    %103 = vector.broadcast %cst_54 : f32 to vector<8x1xf32>
    %104 = arith.addf %100, %103 : vector<8x1xf32>
    %105 = math.rsqrt %104 : vector<8x1xf32>
    %106 = vector.broadcast %105 : vector<8x1xf32> to vector<8x32xf32>
    %107 = arith.mulf %102, %106 : vector<8x32xf32>
    %108 = vector.broadcast %88 : vector<1x32xf32> to vector<8x32xf32>
    %109 = arith.mulf %107, %108 : vector<8x32xf32>
    %110 = vector.broadcast %89 : vector<1x32xf32> to vector<8x32xf32>
    %111 = arith.addf %109, %110 : vector<8x32xf32>
    %112 = arith.truncf %111 : vector<8x32xf32> to vector<8x32xbf16>
    %c0_55 = arith.constant 0 : index
    %c0_56 = arith.constant 0 : index
    %113 = vector.load %arg9[%c0_55, %c0_56] : memref<32x64xbf16, #tpu.memory_space<vmem>>, vector<32x64xbf16>
    %cst_57 = arith.constant dense<0.000000e+00> : vector<8x64xf32>
    %114 = tpu.matmul %112, %113, %cst_57 {dimension_numbers = #tpu.dot_dimension_numbers<[1], [0], [0], [1], [0, 0, 1, 1], [], []>} : vector<8x32xbf16>, vector<32x64xbf16>, vector<8x64xf32> -> vector<8x64xf32>
    %c0_58 = arith.constant 0 : index
    %c0_59 = arith.constant 0 : index
    %115 = vector.load %arg10[%c0_58, %c0_59] : memref<1x64xf32, #tpu.memory_space<vmem>>, vector<1x64xf32>
    %116 = vector.broadcast %115 : vector<1x64xf32> to vector<8x64xf32>
    %117 = arith.addf %114, %116 : vector<8x64xf32>
    %118 = arith.mulf %117, %117 : vector<8x64xf32>
    %119 = arith.mulf %117, %118 : vector<8x64xf32>
    %cst_60 = arith.constant 4.471500e-02 : f32
    %120 = vector.broadcast %cst_60 : f32 to vector<8x64xf32>
    %121 = arith.mulf %120, %119 : vector<8x64xf32>
    %122 = arith.addf %117, %121 : vector<8x64xf32>
    %cst_61 = arith.constant 0.797884583 : f32
    %123 = vector.broadcast %cst_61 : f32 to vector<8x64xf32>
    %124 = arith.mulf %123, %122 : vector<8x64xf32>
    %125 = math.tanh %124 : vector<8x64xf32>
    %cst_62 = arith.constant 1.000000e+00 : f32
    %126 = vector.broadcast %cst_62 : f32 to vector<8x64xf32>
    %127 = arith.addf %126, %125 : vector<8x64xf32>
    %cst_63 = arith.constant 5.000000e-01 : f32
    %128 = vector.broadcast %cst_63 : f32 to vector<8x64xf32>
    %129 = arith.mulf %128, %127 : vector<8x64xf32>
    %130 = arith.mulf %117, %129 : vector<8x64xf32>
    %131 = arith.truncf %130 : vector<8x64xf32> to vector<8x64xbf16>
    %c0_64 = arith.constant 0 : index
    %c0_65 = arith.constant 0 : index
    %132 = vector.load %arg11[%c0_64, %c0_65] : memref<64x32xbf16, #tpu.memory_space<vmem>>, vector<64x32xbf16>
    %cst_66 = arith.constant dense<0.000000e+00> : vector<8x32xf32>
    %133 = tpu.matmul %131, %132, %cst_66 {dimension_numbers = #tpu.dot_dimension_numbers<[1], [0], [0], [1], [0, 0, 1, 1], [], []>} : vector<8x64xbf16>, vector<64x32xbf16>, vector<8x32xf32> -> vector<8x32xf32>
    %c0_67 = arith.constant 0 : index
    %c0_68 = arith.constant 0 : index
    %134 = vector.load %arg12[%c0_67, %c0_68] : memref<1x32xf32, #tpu.memory_space<vmem>>, vector<1x32xf32>
    %135 = vector.broadcast %134 : vector<1x32xf32> to vector<8x32xf32>
    %136 = arith.addf %133, %135 : vector<8x32xf32>
    %137 = arith.addf %136, %111 : vector<8x32xf32>
    %c0_69 = arith.constant 0 : index
    %c0_70 = arith.constant 0 : index
    %138 = vector.load %arg13[%c0_69, %c0_70] : memref<1x32xf32, #tpu.memory_space<vmem>>, vector<1x32xf32>
    %c0_71 = arith.constant 0 : index
    %c0_72 = arith.constant 0 : index
    %139 = vector.load %arg14[%c0_71, %c0_72] : memref<1x32xf32, #tpu.memory_space<vmem>>, vector<1x32xf32>
    %cst_73 = arith.constant dense<0.000000e+00> : vector<8xf32>
    %140 = vector.multi_reduction <add>, %137, %cst_73 [1] : vector<8x32xf32> to vector<8xf32>
    %141 = vector.shape_cast %140 : vector<8xf32> to vector<8x1xf32>
    %cst_74 = arith.constant 3.200000e+01 : f32
    %142 = vector.broadcast %cst_74 : f32 to vector<8x1xf32>
    %143 = arith.divf %141, %142 : vector<8x1xf32>
    %144 = arith.mulf %137, %137 : vector<8x32xf32>
    %cst_75 = arith.constant dense<0.000000e+00> : vector<8xf32>
    %145 = vector.multi_reduction <add>, %144, %cst_75 [1] : vector<8x32xf32> to vector<8xf32>
    %146 = vector.shape_cast %145 : vector<8xf32> to vector<8x1xf32>
    %cst_76 = arith.constant 3.200000e+01 : f32
    %147 = vector.broadcast %cst_76 : f32 to vector<8x1xf32>
    %148 = arith.divf %146, %147 : vector<8x1xf32>
    %149 = arith.mulf %143, %143 : vector<8x1xf32>
    %150 = arith.subf %148, %149 : vector<8x1xf32>
    %151 = vector.broadcast %143 : vector<8x1xf32> to vector<8x32xf32>
    %152 = arith.subf %137, %151 : vector<8x32xf32>
    %cst_77 = arith.constant 9.99999996E-13 : f32
    %153 = vector.broadcast %cst_77 : f32 to vector<8x1xf32>
    %154 = arith.addf %150, %153 : vector<8x1xf32>
    %155 = math.rsqrt %154 : vector<8x1xf32>
    %156 = vector.broadcast %155 : vector<8x1xf32> to vector<8x32xf32>
    %157 = arith.mulf %152, %156 : vector<8x32xf32>
    %158 = vector.broadcast %138 : vector<1x32xf32> to vector<8x32xf32>
    %159 = arith.mulf %157, %158 : vector<8x32xf32>
    %160 = vector.broadcast %139 : vector<1x32xf32> to vector<8x32xf32>
    %161 = arith.addf %159, %160 : vector<8x32xf32>
    %162 = arith.truncf %161 : vector<8x32xf32> to vector<8x32xbf16>
    %c0_78 = arith.constant 0 : index
    %c0_79 = arith.constant 0 : index
    %c0_80 = arith.constant 0 : index
    %163 = vector.load %arg17[%c0_78, %c0_79, %c0_80] : memref<1x8x32xbf16, #tpu.memory_space<vmem>>, vector<1x8x32xbf16>
    %164 = vector.shape_cast %163 : vector<1x8x32xbf16> to vector<8x32xbf16>
    %165 = vector.shape_cast %162 : vector<8x32xbf16> to vector<1x8x32xbf16>
    tpu.vector_store %arg17[%c0_78, %c0_79, %c0_80], %165 {strides = array<i32>} : memref<1x8x32xbf16, #tpu.memory_space<vmem>>, vector<1x8x32xbf16>,
    return
  }
  func.func @transform_0(%arg0: i32) -> (i32, i32, i32) {
    %c0_i32 = arith.constant 0 : i32
    %c0_i32_0 = arith.constant 0 : i32
    %c0_i32_1 = arith.constant 0 : i32
    return %arg0, %c0_i32, %c0_i32_0 : i32, i32, i32
  }
  func.func @transform_1(%arg0: i32) -> (i32, i32, i32) {
    %c0_i32 = arith.constant 0 : i32
    %c0_i32_0 = arith.constant 0 : i32
    %c0_i32_1 = arith.constant 0 : i32
    return %arg0, %c0_i32, %c0_i32_0 : i32, i32, i32
  }
  func.func @transform_2(%arg0: i32) -> (i32, i32) {
    %c0_i32 = arith.constant 0 : i32
    %c0_i32_0 = arith.constant 0 : i32
    %c0_i32_1 = arith.constant 0 : i32
    return %c0_i32, %c0_i32_0 : i32, i32
  }
  func.func @transform_3(%arg0: i32) -> (i32, i32) {
    %c0_i32 = arith.constant 0 : i32
    %c0_i32_0 = arith.constant 0 : i32
    %c0_i32_1 = arith.constant 0 : i32
    return %c0_i32, %c0_i32_0 : i32, i32
  }
  func.func @transform_4(%arg0: i32) -> (i32, i32) {
    %c0_i32 = arith.constant 0 : i32
    %c0_i32_0 = arith.constant 0 : i32
    %c0_i32_1 = arith.constant 0 : i32
    return %c0_i32, %c0_i32_0 : i32, i32
  }
  func.func @transform_5(%arg0: i32) -> (i32, i32) {
    %c0_i32 = arith.constant 0 : i32
    %c0_i32_0 = arith.constant 0 : i32
    %c0_i32_1 = arith.constant 0 : i32
    return %c0_i32, %c0_i32_0 : i32, i32
  }
  func.func @transform_6(%arg0: i32) -> (i32, i32) {
    %c0_i32 = arith.constant 0 : i32
    %c0_i32_0 = arith.constant 0 : i32
    %c0_i32_1 = arith.constant 0 : i32
    return %c0_i32, %c0_i32_0 : i32, i32
  }
  func.func @transform_7(%arg0: i32) -> (i32, i32) {
    %c0_i32 = arith.constant 0 : i32
    %c0_i32_0 = arith.constant 0 : i32
    %c0_i32_1 = arith.constant 0 : i32
    return %c0_i32, %c0_i32_0 : i32, i32
  }
  func.func @transform_8(%arg0: i32) -> (i32, i32) {
    %c0_i32 = arith.constant 0 : i32
    %c0_i32_0 = arith.constant 0 : i32
    %c0_i32_1 = arith.constant 0 : i32
    return %c0_i32, %c0_i32_0 : i32, i32
  }
  func.func @transform_9(%arg0: i32) -> (i32, i32) {
    %c0_i32 = arith.constant 0 : i32
    %c0_i32_0 = arith.constant 0 : i32
    %c0_i32_1 = arith.constant 0 : i32
    return %c0_i32, %c0_i32_0 : i32, i32
  }
  func.func @transform_10(%arg0: i32) -> (i32, i32) {
    %c0_i32 = arith.constant 0 : i32
    %c0_i32_0 = arith.constant 0 : i32
    %c0_i32_1 = arith.constant 0 : i32
    return %c0_i32, %c0_i32_0 : i32, i32
  }
  func.func @transform_11(%arg0: i32) -> (i32, i32) {
    %c0_i32 = arith.constant 0 : i32
    %c0_i32_0 = arith.constant 0 : i32
    %c0_i32_1 = arith.constant 0 : i32
    return %c0_i32, %c0_i32_0 : i32, i32
  }
  func.func @transform_12(%arg0: i32) -> (i32, i32) {
    %c0_i32 = arith.constant 0 : i32
    %c0_i32_0 = arith.constant 0 : i32
    %c0_i32_1 = arith.constant 0 : i32
    return %c0_i32, %c0_i32_0 : i32, i32
  }
  func.func @transform_13(%arg0: i32) -> (i32, i32) {
    %c0_i32 = arith.constant 0 : i32
    %c0_i32_0 = arith.constant 0 : i32
    %c0_i32_1 = arith.constant 0 : i32
    return %c0_i32, %c0_i32_0 : i32, i32
  }
  func.func @transform_14(%arg0: i32) -> (i32, i32) {
    %c0_i32 = arith.constant 0 : i32
    %c0_i32_0 = arith.constant 0 : i32
    %c0_i32_1 = arith.constant 0 : i32
    return %c0_i32, %c0_i32_0 : i32, i32
  }
  func.func @transform_15(%arg0: i32) -> (i32, i32) {
    %c0_i32 = arith.constant 0 : i32
    %c0_i32_0 = arith.constant 0 : i32
    %c0_i32_1 = arith.constant 0 : i32
    return %c0_i32, %c0_i32_0 : i32, i32
  }
  func.func @transform_16(%arg0: i32) -> (i32, i32, i32) {
    %c0_i32 = arith.constant 0 : i32
    %c0_i32_0 = arith.constant 0 : i32
    %c0_i32_1 = arith.constant 0 : i32
    return %arg0, %c0_i32, %c0_i32_0 : i32, i32, i32
  }
}

</mosaic_0001>

<bundles_post_ra>
// kernel: bert_softmax_ner_forward.5
= control target key start
LH: loop header
LB: loop body
LE: loop exit
PB: predicated region body
PF: predicated region fallthrough
CT: control target
= control target key end

     0   :  { %v117_v0 = vmov 0.0   ;;  %vm118_vm0 = vmmov 0   ;;  %vm45_vm1 = vcmask 261120   ;;  %s157_s1 = inlined_call_operand.vmem [shape: bf16[32,128], index: 1, kind: input, shape index: {}]   ;;  %s158_s0 = inlined_call_operand.vmem [shape: bf16[16,32], index: 0, kind: input, shape index: {}]   ;;  %s159_s2 = inlined_call_operand.vmem [shape: f32[1,128], index: 2, kind: input, shape index: {}]   ;;  %s160_s3 = inlined_call_operand.vmem [shape: f32[16,128], index: 3, kind: output, shape index: {}]  }
   0x1   :  { %104 = vmatprep.subr.bf16.mxu0 %v117_v0  ;;  %v114_v1 = vld [vmem:[%s157_s1 + $0x8] sm:$0xff]   ;;  %108 = vmatprep.mubr.msk.bf16.mxu0 %vm118_vm0, %v117_v0  ;;  %v115_v2 = vld [vmem:[%s157_s1] sm:$0xff]  }
   0x2   :  { %105 = vmatpush3.bf16.msra.mxu0 %v114_v1  ;;  %v116_v3 = vld [vmem:[%s158_s0] sm:$0xff]  }
   0x3   :  { %106 = vmatprep.subr.bf16.mxu0 %v117_v0  ;;  %v96_v4 = vld [vmem:[%s159_s2] ss:$0 sm:$0xff] }
   0x6   :  { %107 = vmatpush3.bf16.msra.mxu0 %v115_v2 }
   0x9   :  { %109 = vmatmul.mubr.msk.bf16.vlgmr.msra.gmra.mxu0 %vm45_vm1, %v116_v3 }
  0xc9   :  { %v83_v5 = vpop.f32.mrf.mxu0 }
  0xca   :  { %v84_v6 = vadd.f32 %v96_v4, %v83_v5 }
  0xcb   :  { %v110_v7 = vpop.f32.mrf.mxu0 }
  0xcc   :  { %90 = vst [vmem:[%s160_s3] sm:$0xff] %v84_v6 }
  0xcd   :  { %v86_v8 = vpop.f32.mrf.mxu0 }
  0xce   :  { %v87_v9 = vadd.f32 %v96_v4, %v86_v8 }
  0xcf   :  { %v111_v10 = vpop.f32.mrf.mxu0 }
  0xd0   :  { %91 = vst [vmem:[%s160_s3 + $0x8] sm:$0xff] %v87_v9 }

// kernel: bert_softmax_ner_forward.3
= control target key start
LH: loop header
LB: loop body
LE: loop exit
PB: predicated region body
PF: predicated region fallthrough
CT: control target
= control target key end

     0   :  { %s1497_s21 = smov 0   ;;  %s1640_s0 = inlined_call_operand.vmem [shape: bf16[2,8,32], index: 0, kind: input, shape index: {}]   ;;  %s1641_s1 = inlined_call_operand.vmem [shape: f32[2,1,8], index: 1, kind: input, shape index: {}]   ;;  %s1642_s2 = inlined_call_operand.vmem [shape: bf16[32,96], index: 2, kind: input, shape index: {}]   ;;  %s1643_s3 = inlined_call_operand.vmem [shape: f32[1,96], index: 3, kind: input, shape index: {}]   ;;  %s1644_s4 = inlined_call_operand.vmem [shape: bf16[32,32], index: 4, kind: input, shape index: {}]   ;;  %s1645_s5 = inlined_call_operand.vmem [shape: f32[1,32], index: 5, kind: input, shape index: {}]   ;;  %s1646_s6 = inlined_call_operand.vmem [shape: f32[1,32], index: 6, kind: input, shape index: {}]   ;;  %s1647_s7 = inlined_call_operand.vmem [shape: f32[1,32], index: 7, kind: input, shape index: {}]   ;;  %s1648_s8 = inlined_call_operand.vmem [shape: bf16[32,64], index: 8, kind: input, shape index: {}]   ;;  %s1649_s9 = inlined_call_operand.vmem [shape: f32[1,64], index: 9, kind: input, shape index: {}]   ;;  %s1650_s10 = inlined_call_operand.vmem [shape: bf16[64,32], index: 10, kind: input, shape index: {}]   ;;  %s1651_s11 = inlined_call_operand.vmem [shape: f32[1,32], index: 11, kind: input, shape index: {}]   ;;  %s1652_s12 = inlined_call_operand.vmem [shape: f32[1,32], index: 12, kind: input, shape index: {}]   ;;  %s1653_s13 = inlined_call_operand.vmem [shape: f32[1,32], index: 13, kind: input, shape index: {}]   ;;  %s1654_s14 = inlined_call_operand.vmem [shape: f32[1,32], index: 14, kind: input, shape index: {}]   ;;  %s1655_s15 = inlined_call_operand.vmem [shape: f32[1,32], index: 15, kind: input, shape index: {}]   ;;  %s1656_s16 = inlined_call_operand.vmem [shape: bf16[2,8,32], index: 16, kind: output, shape index: {}]  }
   0x1   :  { %1657 = sst [smem:[#allocation4_spill]] %s1640_s0 }
   0x2 LB: > { %s1234_s22 = sadd.s32 4294967295, %s1402_s21   ;;  %p1238_p0 = scmp.ge.s32.totalorder %s1402_s21, 1  ;;  %s1402_s21 = sphi %s1497_s21, %s26_s21  }
   0x3   : > { %p469_p1 = scmp.lt.s32.totalorder %s1402_s21, 3 }
   0x5   : > { %p470_p2 = pnand %p1238_p0, %p469_p1 }
   0x6   : > { %p520_p3 = scmp.lt.s32.totalorder (!%p470_p2), %s1234_s22, 1  ;;  %s1658_s26 = sld [smem:[#allocation4_spill]] (!%p470_p2) }
   0x7   : > { %473 = sbr.rel (%p470_p2) target bundleno = 2314 (0x90a), region = 84  ;;  %s1408_s28 = smov (!%p470_p2), 80  }
   0x8   : > { %s1409_s17 = smov (!%p470_p2), 48   ;;  %s1410_s18 = smov (!%p470_p2), 64  }
   0xc   : > { %s1660_s22 = smov (!%p520_p3, %s1234_s22), 1  ;;  %vm536_vm0 = vcmask 261120   ;;  %v1370_v5 = vld [vmem:[%s1642_s2 + $0x8] sm:$0xff]   ;;  %v1404_v6 = vmov 0.0   ;;  %vm1405_vm1 = vmmov 0   ;;  %v1371_v7 = vld [vmem:[%s1642_s2] sm:$0xff]  }
   0xd   : > { %s1239_s23 = sshll.u32 %s1660_s22, 2  ;;  %1294 = vmatprep.subr.bf16.mxu0 %v1404_v6  ;;  %1298 = vmatprep.mubr.msk.bf16.mxu0 %vm1405_vm1, %v1404_v6  ;;  %v1241_v17 = vld [vmem:[%s1654_s14] ss:$0 sm:$0xff]  ;;  %vm635_vm2 = vcmask 785408   ;;  %vm648_vm3 = vcmask 130048   ;;  %s526_s0 = scalar_lea.vmem %s1641_s1, %s1660_s22  ;;  %vm695_vm4 = vcmask 64512  }
   0xe   : > { %s523_s27 = scalar_lea.vmem %s1658_s26, %s1239_s23  ;;  %1295 = vmatpush3.bf16.msra.mxu0 %v1370_v5  ;;  %1302 = vmatprep.subr.bf16.mxu1 %v1404_v6  ;;  %v1242_v19 = vld [vmem:[%s1655_s15] ss:$0 sm:$0xff]  ;;  %s1406_s26 = smov 112   ;;  %vm713_vm5 = vcmask 1043456   ;;  %vm875_vm6 = vcmask 261248   ;;  %vm1093_vm7 = vcmask 523264  }
   0xf   : > { %v532_v0 = vld [vmem:[%s523_s27] sm:$0xf]  ;;  %1296 = vmatprep.subr.bf16.mxu0 %v1404_v6  ;;  %1304 = vmatprep.mubr.msk.bf16.mxu1 %vm1405_vm1, %v1404_v6  ;;  %s1407_s27 = smov 96   ;;  %vm1170_vm8 = vcmask 257024  }
  0x10   : > { %v533_v1 = vunpack.c.l.bf16 %v532_v0  ;;  %v1243_v23 = vld [vmem:[%s1643_s3] ss:$0 sm:$0xff] }
  0x11   : > { %v1247_v36 = vld [vmem:[%s526_s0] ss:$0 sm:$0xff]  ;;  %s530_s0 = scalar_lea.vmem %s1656_s16, %s1239_s23 }
  0x12   : > { %v537_v2 = vsel %vm536_vm0, %v533_v1, 0.0  ;;  %v542_v3 = vmul.f32 %v533_v1, %v533_v1  ;;  %1297 = vmatpush3.bf16.msra.mxu0 %v1371_v7 }
  0x13   : > { %538 = vadd.xlane.f32.xlu0 %v537_v2  ;;  %1308 = vmatprep.subr.bf16.mxu0 %v1404_v6 }
  0x14   : > { %v543_v4 = vsel %vm536_vm0, %v542_v3, 0.0 }
  0x17   : > { %544 = vadd.xlane.f32.xlu0 %v543_v4 }
  0x9c   : > { %v539_v8 = vpop.xlane.xlu0 %538 }
  0x9d   : > { %v541_v9 = vmul.f32 0.03125, %v539_v8  ;;  %v1372_v8 = vld [vmem:[%s1644_s4 + $0x8] sm:$0xff]  }
  0x9f   : > { %v547_v11 = vmul.f32 %v541_v9, %v541_v9  ;;  %v549_v15 = vsub.f32 %v533_v1, %v541_v9  ;;  %v1373_v9 = vld [vmem:[%s1644_s4] sm:$0xff]  }
  0xa0   : > { %v545_v10 = vpop.xlane.xlu0 %544 }
  0xa1   : > { %v546_v12 = vmul.f32 0.03125, %v545_v10 }
  0xa3   : > { %v548_v13 = vsub.f32 %v546_v12, %v547_v11 }
  0xa5   : > { %v550_v14 = vadd.f32 1e-12, %v548_v13 }
  0xa7   : > { %1380 = vrsqrt.f32 %v550_v14 }
  0xb4   : > { %v1381_v16 = vpop.eup %1380 }
  0xb5   : > { %v552_v18 = vmul.f32 %v1381_v16, %v549_v15 }
  0xb7   : > { %v559_v20 = vmul.f32 %v1241_v17, %v552_v18 }
  0xb9   : > { %v1535_v21 = vadd.f32 %v1242_v19, %v559_v20 }
  0xbb   : > { %v568_v22 = vpack.c.bf16 %v1535_v21, %v1535_v21 }
  0xbd   : > { %1299 = vmatmul.mubr.msk.bf16.vlgmr.msra.gmra.mxu0 %vm536_vm0, %v568_v22  ;;  %v1252_v22 = vld [vmem:[%s1645_s5] ss:$0 sm:$0xff] }
  0xbe   : > { %1310 = vmatprep.mubr.msk.bf16.mxu0 %vm1405_vm1, %v1404_v6 }
 0x17d   : > { %v629_v24 = vpop.f32.mrf.mxu0 }
 0x17e   : > { %v630_v25 = vadd.f32 %v1243_v23, %v629_v24 }
 0x17f   : > { %v1300_v26 = vpop.f32.mrf.mxu0 }
 0x180   : > { %636 = vst.msk [vmem:[#allocation2] sm:$0xff] %vm635_vm2, %v630_v25 }
 0x181   : > { %v632_v27 = vpop.f32.mrf.mxu0 }
 0x183   : > { %v1301_v28 = vpop.f32.mrf.mxu0 }
 0x187   : > { %v758_v29 = vld [vmem:[#allocation2] sm:$0xff] }
 0x188   : > { %v759_v30 = vpack.c.bf16 %v758_v29, %v758_v29 }
 0x18a   : > { %761 = vrot.lane.b32.xlu0 %v759_v30, %s1406_s26  ;;  %646 = vrot.lane.b32.xlu1 %v759_v30, %s1407_s27  ;;  %s1411_s26 = smov 16  }
 0x18e   : > { %763 = vrot.lane.b32.xlu1 %v759_v30, %s1408_s28 }
 0x1fc   : > { %v647_v31 = vpop.permute.xlu1 %646  ;;  %v762_v35 = vpop.permute.xlu0 %761 }
 0x1fd   : > { %v653_v32 = vsel %vm648_vm3, %v647_v31, 0 }
 0x1fe   : > { %1303 = vmatpush3.bf16.xpose.msra.mxu1 %v653_v32  ;;  %v1374_v32 = vld [vmem:[%s1648_s8 + $0x8] sm:$0xff]  }
 0x1ff   : > { %1314 = vmatprep.subr.bf16.mxu1 %v1404_v6 }
 0x200   : > { %v764_v33 = vpop.permute.xlu1 %763 }
 0x201   : > { %v769_v34 = vsel %vm648_vm3, %v764_v33, 0  ;;  %v1375_v33 = vld [vmem:[%s1648_s8] sm:$0xff]  }
 0x205   : > { %1305 = vmatmul.mubr.msk.bf16.vlgmr.msra.gmra.mxu1 %vm648_vm3, %v759_v30 }
 0x206   : > { %1315 = vmatpush3.bf16.xpose.msra.mxu1 %v769_v34  ;;  %1316 = vmatprep.mubr.msk.bf16.mxu1 %vm1405_vm1, %v1404_v6 }
 0x207   : > { %1326 = vmatprep.subr.bf16.mxu1 %v1404_v6 }
 0x20d   : > { %1317 = vmatmul.mubr.msk.bf16.vlgmr.msra.gmra.mxu1 %vm648_vm3, %v762_v35 }
 0x20e   : > { %1330 = vmatprep.mubr.msk.bf16.mxu1 %vm1405_vm1, %v1404_v6  ;;  %1327 = vmatpush3.bf16.msra.mxu1 %v1372_v8 }
 0x20f   : > { %1328 = vmatprep.subr.bf16.mxu1 %v1404_v6 }
 0x212   : > { %1329 = vmatpush3.bf16.msra.mxu1 %v1373_v9 }
 0x213   : > { %1342 = vmatprep.subr.bf16.mxu1 %v1404_v6 }
 0x2c5   : > { %v689_v37 = vpop.f32.mrf.mxu1 }
 0x2c6   : > { %v690_v38 = vadd.f32 %v1247_v36, %v689_v37 }
 0x2c7   : > { %v1306_v39 = vpop.f32.mrf.mxu1 }
 0x2c8   : > { %v696_v40 = vsel %vm695_vm4, %v690_v38, -inf }
 0x2c9   : > { %697 = vmax.xlane.f32.xlu1 %v696_v40  ;;  %v692_v41 = vpop.f32.mrf.mxu1 }
 0x2cb   : > { %v1307_v42 = vpop.f32.mrf.mxu1 }
 0x2cc   : > { %v1256_v42 = vld [vmem:[%s1646_s6] ss:$0 sm:$0xff] }
 0x2cd   : > { %v805_v43 = vpop.f32.mrf.mxu1 }
 0x2ce   : > { %v806_v44 = vadd.f32 %v1247_v36, %v805_v43 }
 0x2cf   : > { %v1318_v45 = vpop.f32.mrf.mxu1 }
 0x2d0   : > { %v811_v46 = vsel %vm695_vm4, %v806_v44, -inf }
 0x2d1   : > { %812 = vmax.xlane.f32.xlu0 %v811_v46  ;;  %v808_v47 = vpop.f32.mrf.mxu1 }
 0x2d3   : > { %v1319_v48 = vpop.f32.mrf.mxu1 }
 0x2d4   : > { %v1376_v48 = vld [vmem:[%s1650_s10 + $0x18] sm:$0xff]  }
 0x2e7   : > { %823 = vrot.lane.b32.xlu0 %v759_v30, %s1409_s17 }
 0x352   : > { %v698_v49 = vpop.xlane.xlu1 %697 }
 0x353   : > { %v699_v50 = vsub.f32 %v690_v38, %v698_v49  ;;  %v1377_v49 = vld [vmem:[%s1650_s10 + $0x10] sm:$0xff]  }
 0x355   : > { %v700_v51 = vmul.f32 1.442695, %v699_v50  ;;  %v1378_v50 = vld [vmem:[%s1650_s10 + $0x8] sm:$0xff]  }
 0x357   : > { %1382 = vpow2.f32 %v700_v51  ;;  %v1379_v51 = vld [vmem:[%s1650_s10] sm:$0xff]  }
 0x35a   : > { %v813_v52 = vpop.xlane.xlu0 %812 }
 0x35b   : > { %v814_v53 = vsub.f32 %v806_v44, %v813_v52  ;;  %v1257_v44 = vld [vmem:[%s1647_s7] ss:$0 sm:$0xff] }
 0x35c   : > { %v1258_v52 = vld [vmem:[%s1649_s9] ss:$0 sm:$0xff] }
 0x35d   : > { %v815_v54 = vmul.f32 1.442695, %v814_v53 }
 0x35e   : > { %v824_v1 = vpop.permute.xlu0 %823 }
 0x35f   : > { %1384 = vpow2.f32 %v815_v54  ;;  %v829_v3 = vsel %vm713_vm5, %v824_v1, 0 }
 0x364   : > { %v1383_v55 = vpop.eup %1382 }
 0x365   : > { %v702_v56 = vsel %vm695_vm4, %v1383_v55, 0.0 }
 0x366   : > { %703 = vadd.xlane.f32.xlu1 %v702_v56 }
 0x36c   : > { %v1385_v57 = vpop.eup %1384 }
 0x36d   : > { %v817_v58 = vsel %vm695_vm4, %v1385_v57, 0.0 }
 0x36e   : > { %818 = vadd.xlane.f32.xlu1 %v817_v58 }
 0x37f   : > { %708 = vrot.lane.b32.xlu1 %v759_v30, %s1410_s18 }
 0x3ef   : > { %v704_v59 = vpop.xlane.xlu1 %703 }
 0x3f0   : > { %1386 = vrcp.f32 %v704_v59 }
 0x3f7   : > { %v819_v60 = vpop.xlane.xlu1 %818 }
 0x3f8   : > { %1388 = vrcp.f32 %v819_v60 }
 0x3fb   : > { %v709_v61 = vpop.permute.xlu1 %708 }
 0x3fc   : > { %v715_v62 = vsel %vm713_vm5, %v709_v61, 0 }
 0x3fd   : > { %v1387_v63 = vpop.eup %1386  ;;  %1309 = vmatpush3.bf16.msra.mxu0 %v715_v62 }
 0x3fe   : > { %1320 = vmatprep.subr.bf16.mxu0 %v1404_v6  ;;  %v706_v0 = vmul.f32 %v1387_v63, %v1383_v55 }
 0x400   : > { %v707_v2 = vpack.c.bf16 %v706_v0, %v706_v0 }
 0x402   : > { %1311 = vmatmul.mubr.msk.bf16.vlgmr.msra.gmra.mxu0 %vm695_vm4, %v707_v2 }
 0x403   : > { %1321 = vmatpush3.bf16.msra.mxu0 %v829_v3  ;;  %1322 = vmatprep.mubr.msk.bf16.mxu0 %vm1405_vm1, %v1404_v6  ;;  %v1262_v3 = vld [vmem:[%s1651_s11] ss:$0 sm:$0xff] }
 0x404   : > { %1334 = vmatprep.subr.bf16.mxu0 %v1404_v6 }
 0x405   : > { %v1389_v4 = vpop.eup %1388 }
 0x406   : > { %v821_v5 = vmul.f32 %v1389_v4, %v1385_v57 }
 0x408   : > { %v822_v7 = vpack.c.bf16 %v821_v5, %v821_v5 }
 0x40a   : > { %1323 = vmatmul.mubr.msk.bf16.vlgmr.msra.gmra.mxu0 %vm695_vm4, %v822_v7 }
 0x40b   : > { %1338 = vmatprep.mubr.msk.bf16.mxu0 %vm1405_vm1, %v1404_v6  ;;  %1335 = vmatpush3.bf16.msra.mxu0 %v1374_v32 }
 0x40c   : > { %1336 = vmatprep.subr.bf16.mxu0 %v1404_v6 }
 0x40f   : > { %1337 = vmatpush3.bf16.msra.mxu0 %v1375_v33 }
 0x4c2   : > { %v751_v10 = vpop.f32.mrf.mxu0 }
 0x4c3   : > { %757 = vst.msk [vmem:[#allocation3] sm:$0xff] %vm648_vm3, %v751_v10 }
 0x4c4   : > { %v1312_v11 = vpop.f32.mrf.mxu0 }
 0x4c6   : > { %v754_v12 = vpop.f32.mrf.mxu0 }
 0x4c8   : > { %v1313_v13 = vpop.f32.mrf.mxu0 }
 0x4ca   : > { %v865_v14 = vpop.f32.mrf.mxu0 }
 0x4cb   : > { %872 = vrot.lane.b32.xlu1 %v865_v14, %s1411_s26 }
 0x4cc   : > { %v1324_v15 = vpop.f32.mrf.mxu0 }
 0x4ce   : > { %v868_v16 = vpop.f32.mrf.mxu0 }
 0x4d0   : > { %v1325_v17 = vpop.f32.mrf.mxu0 }
 0x53d   : > { %v873_v18 = vpop.permute.xlu1 %872 }
 0x53e   : > { %876 = vst.msk [vmem:[#allocation3] sm:$0xff] %vm875_vm6, %v873_v18 }
 0x545   : > { %v877_v19 = vld [vmem:[#allocation3] sm:$0xff] }
 0x546   : > { %v878_v20 = vpack.c.bf16 %v877_v19, %v877_v19 }
 0x548   : > { %1331 = vmatmul.mubr.msk.bf16.vlgmr.msra.gmra.mxu1 %vm536_vm0, %v878_v20 }
 0x549   : > { %1350 = vmatprep.mubr.msk.bf16.mxu1 %vm1405_vm1, %v1404_v6  ;;  %1343 = vmatpush3.bf16.msra.mxu1 %v1376_v48 }
 0x54a   : > { %1344 = vmatprep.subr.bf16.mxu1 %v1404_v6 }
 0x54d   : > { %1345 = vmatpush3.bf16.msra.mxu1 %v1377_v49 }
 0x54e   : > { %1346 = vmatprep.subr.bf16.mxu1 %v1404_v6 }
 0x551   : > { %1347 = vmatpush3.bf16.msra.mxu1 %v1378_v50 }
 0x552   : > { %1348 = vmatprep.subr.bf16.mxu1 %v1404_v6 }
 0x555   : > { %1349 = vmatpush3.bf16.msra.mxu1 %v1379_v51 }
 0x608   : > { %v939_v23 = vpop.f32.mrf.mxu1 }
 0x609   : > { %v940_v24 = vadd.f32 %v1252_v22, %v939_v23 }
 0x60a   : > { %v1332_v25 = vpop.f32.mrf.mxu1 }
 0x60b   : > { %v945_v26 = vadd.f32 %v940_v24, %v1535_v21  ;;  %v1268_v24 = vld [vmem:[%s1652_s12] ss:$0 sm:$0xff] }
 0x60c   : > { %v942_v27 = vpop.f32.mrf.mxu1 }
 0x60d   : > { %v948_v28 = vsel %vm536_vm0, %v945_v26, 0.0  ;;  %v952_v29 = vmul.f32 %v945_v26, %v945_v26 }
 0x60e   : > { %949 = vadd.xlane.f32.xlu1 %v948_v28  ;;  %v1333_v30 = vpop.f32.mrf.mxu1 }
 0x60f   : > { %v953_v31 = vsel %vm536_vm0, %v952_v29, 0.0 }
 0x610   : > { %954 = vadd.xlane.f32.xlu0 %v953_v31 }
 0x697   : > { %v950_v21 = vpop.xlane.xlu1 %949 }
 0x698   : > { %v951_v34 = vmul.f32 0.03125, %v950_v21 }
 0x699   : > { %v955_v35 = vpop.xlane.xlu0 %954 }
 0x69a   : > { %v957_v36 = vmul.f32 %v951_v34, %v951_v34  ;;  %v956_v37 = vmul.f32 0.03125, %v955_v35  ;;  %v959_v40 = vsub.f32 %v945_v26, %v951_v34  ;;  %v1269_v26 = vld [vmem:[%s1653_s13] ss:$0 sm:$0xff] }
 0x69c   : > { %v958_v38 = vsub.f32 %v956_v37, %v957_v36 }
 0x69e   : > { %v960_v39 = vadd.f32 1e-12, %v958_v38 }
 0x6a0   : > { %1390 = vrsqrt.f32 %v960_v39 }
 0x6ad   : > { %v1391_v41 = vpop.eup %1390 }
 0x6ae   : > { %v962_v43 = vmul.f32 %v1391_v41, %v959_v40 }
 0x6b0   : > { %v969_v45 = vmul.f32 %v1256_v42, %v962_v43 }
 0x6b2   : > { %v976_v46 = vadd.f32 %v1257_v44, %v969_v45 }
 0x6b4   : > { %v977_v47 = vpack.c.bf16 %v976_v46, %v976_v46 }
 0x6b6   : > { %1339 = vmatmul.mubr.msk.bf16.vlgmr.msra.gmra.mxu0 %vm536_vm0, %v977_v47 }
 0x776   : > { %v1038_v53 = vpop.f32.mrf.mxu0 }
 0x777   : > { %v1039_v54 = vadd.f32 %v1258_v52, %v1038_v53 }
 0x778   : > { %v1340_v55 = vpop.f32.mrf.mxu0 }
 0x779   : > { %v1044_v56 = vmul.f32 %v1039_v54, %v1039_v54 }
 0x77a   : > { %v1041_v57 = vpop.f32.mrf.mxu0 }
 0x77b   : > { %v1045_v58 = vmul.f32 %v1044_v56, %v1039_v54 }
 0x77c   : > { %v1341_v59 = vpop.f32.mrf.mxu0 }
 0x77d   : > { %v1046_v60 = vmul.f32 0.044715, %v1045_v58 }
 0x77f   : > { %v1047_v61 = vadd.f32 %v1046_v60, %v1039_v54 }
 0x781   : > { %v1048_v62 = vmul.f32 0.7978846, %v1047_v61 }
 0x783   : > { %1392 = vtanh.f32 %v1048_v62 }
 0x790   : > { %v1393_v6 = vpop.eup %1392 }
 0x791   : > { %v1050_v63 = vadd.f32 1.0, %v1393_v6 }
 0x793   : > { %v1051_v0 = vmul.f32 0.5, %v1050_v63 }
 0x795   : > { %v1052_v1 = vmul.f32 %v1051_v0, %v1039_v54 }
 0x797   : > { %v1053_v2 = vpack.c.bf16 %v1052_v1, %v1052_v1 }
 0x799   : > { %1351 = vmatmul.mubr.msk.bf16.vlgmr.msra.gmra.mxu1 %vm1093_vm7, %v1053_v2 }
 0x859   : > { %v1131_v4 = vpop.f32.mrf.mxu1 }
 0x85a   : > { %v1132_v5 = vadd.f32 %v1262_v3, %v1131_v4 }
 0x85b   : > { %v1352_v7 = vpop.f32.mrf.mxu1 }
 0x85c   : > { %v1137_v8 = vadd.f32 %v1132_v5, %v976_v46 }
 0x85d   : > { %v1134_v9 = vpop.f32.mrf.mxu1 }
 0x85e   : > { %v1140_v10 = vsel %vm536_vm0, %v1137_v8, 0.0  ;;  %v1144_v11 = vmul.f32 %v1137_v8, %v1137_v8 }
 0x85f   : > { %1141 = vadd.xlane.f32.xlu1 %v1140_v10  ;;  %v1353_v12 = vpop.f32.mrf.mxu1 }
 0x860   : > { %v1145_v13 = vsel %vm536_vm0, %v1144_v11, 0.0 }
 0x863   : > { %1146 = vadd.xlane.f32.xlu1 %v1145_v13 }
 0x8e8   : > { %v1142_v14 = vpop.xlane.xlu1 %1141 }
 0x8e9   : > { %v1143_v15 = vmul.f32 0.03125, %v1142_v14 }
 0x8eb   : > { %v1149_v17 = vmul.f32 %v1143_v15, %v1143_v15  ;;  %v1151_v22 = vsub.f32 %v1137_v8, %v1143_v15 }
 0x8ec   : > { %v1147_v16 = vpop.xlane.xlu1 %1146 }
 0x8ed   : > { %v1148_v18 = vmul.f32 0.03125, %v1147_v16 }
 0x8ef   : > { %v1150_v19 = vsub.f32 %v1148_v18, %v1149_v17 }
 0x8f1   : > { %v1152_v20 = vadd.f32 1e-12, %v1150_v19 }
 0x8f3   : > { %1394 = vrsqrt.f32 %v1152_v20 }
 0x900   : > { %v1395_v23 = vpop.eup %1394 }
 0x901   : > { %v1154_v25 = vmul.f32 %v1395_v23, %v1151_v22 }
 0x903   : > { %v1161_v27 = vmul.f32 %v1268_v24, %v1154_v25 }
 0x905   : > { %v1168_v28 = vadd.f32 %v1269_v26, %v1161_v27 }
 0x907   : > { %v1169_v29 = vpack.c.bf16 %v1168_v28, %v1168_v28 }
 0x909   : > { %1171 = vst.msk [vmem:[%s530_s0] sm:$0xf] %vm1170_vm8, %v1169_v29 }
 0x90a PF: > { %s26_s21 = sadd.s32 1, %s1402_s21  }
 0x90b   : > { %p23_p4 = scmp.ge.s32.totalorder %s26_s21, 4  }
 0x90d   :  { %25 = sbr.rel (!%p23_p4) target bundleno = 2 (0x2), region = 117 }

// kernel: bert_softmax_ner_forward.4
= control target key start
LH: loop header
LB: loop body
LE: loop exit
PB: predicated region body
PF: predicated region fallthrough
CT: control target
= control target key end

     0   :  { %s1461_s21 = smov 0   ;;  %s1595_s0 = inlined_call_operand.vmem [shape: bf16[2,8,32], index: 0, kind: input, shape index: {}]   ;;  %s1596_s1 = inlined_call_operand.vmem [shape: f32[2,1,8], index: 1, kind: input, shape index: {}]   ;;  %s1597_s2 = inlined_call_operand.vmem [shape: bf16[32,96], index: 2, kind: input, shape index: {}]   ;;  %s1598_s3 = inlined_call_operand.vmem [shape: f32[1,96], index: 3, kind: input, shape index: {}]   ;;  %s1599_s4 = inlined_call_operand.vmem [shape: bf16[32,32], index: 4, kind: input, shape index: {}]   ;;  %s1600_s5 = inlined_call_operand.vmem [shape: f32[1,32], index: 5, kind: input, shape index: {}]   ;;  %s1601_s6 = inlined_call_operand.vmem [shape: f32[1,32], index: 6, kind: input, shape index: {}]   ;;  %s1602_s7 = inlined_call_operand.vmem [shape: f32[1,32], index: 7, kind: input, shape index: {}]   ;;  %s1603_s8 = inlined_call_operand.vmem [shape: bf16[32,64], index: 8, kind: input, shape index: {}]   ;;  %s1604_s9 = inlined_call_operand.vmem [shape: f32[1,64], index: 9, kind: input, shape index: {}]   ;;  %s1605_s10 = inlined_call_operand.vmem [shape: bf16[64,32], index: 10, kind: input, shape index: {}]   ;;  %s1606_s11 = inlined_call_operand.vmem [shape: f32[1,32], index: 11, kind: input, shape index: {}]   ;;  %s1607_s12 = inlined_call_operand.vmem [shape: f32[1,32], index: 12, kind: input, shape index: {}]   ;;  %s1608_s13 = inlined_call_operand.vmem [shape: f32[1,32], index: 13, kind: input, shape index: {}]   ;;  %s1609_s14 = inlined_call_operand.vmem [shape: f32[1,32], index: 14, kind: input, shape index: {}]   ;;  %s1610_s15 = inlined_call_operand.vmem [shape: f32[1,32], index: 15, kind: input, shape index: {}]   ;;  %s1611_s16 = inlined_call_operand.vmem [shape: bf16[2,8,32], index: 16, kind: output, shape index: {}]  }
   0x1   :  { %1612 = sst [smem:[#allocation4_spill]] %s1595_s0 }
   0x2 LB: > { %s1202_s22 = sadd.s32 4294967295, %s1366_s21   ;;  %p1206_p0 = scmp.ge.s32.totalorder %s1366_s21, 1  ;;  %s1366_s21 = sphi %s1461_s21, %s26_s21  }
   0x3   : > { %p469_p1 = scmp.lt.s32.totalorder %s1366_s21, 3 }
   0x5   : > { %p470_p2 = pnand %p1206_p0, %p469_p1 }
   0x6   : > { %p520_p3 = scmp.lt.s32.totalorder (!%p470_p2), %s1202_s22, 1  ;;  %s1613_s28 = sld [smem:[#allocation4_spill]] (!%p470_p2) }
   0x7   : > { %473 = sbr.rel (%p470_p2) target bundleno = 2146 (0x862), region = 84  ;;  %s1370_s17 = smov (!%p470_p2), 112  }
   0x8   : > { %s1371_s18 = smov (!%p470_p2), 96   ;;  %s1372_s19 = smov (!%p470_p2), 80  }
   0x9   : > { %s1373_s23 = smov (!%p470_p2), 64   ;;  %s1374_s24 = smov (!%p470_p2), 48  }
   0xa   : > { %s1375_s30 = smov (!%p470_p2), 16  }
   0xc   : > { %v1336_v0 = vld [vmem:[%s1597_s2 + $0x8] sm:$0xff]   ;;  %v1368_v1 = vmov 0.0   ;;  %v1337_v2 = vld [vmem:[%s1597_s2] sm:$0xff]   ;;  %vm1369_vm0 = vmmov 0   ;;  %s1615_s22 = smov (!%p520_p3, %s1202_s22), 1  ;;  %vm558_vm1 = vcmask 261120  }
   0xd   : > { %1260 = vmatprep.subr.bf16.mxu0 %v1368_v1  ;;  %1268 = vmatprep.subr.bf16.mxu1 %v1368_v1  ;;  %s1207_s25 = sshll.u32 %s1615_s22, 2  ;;  %v1209_v4 = vld [vmem:[%s1598_s3] ss:$0 sm:$0xff]  ;;  %vm602_vm2 = vcmask 785408   ;;  %vm615_vm3 = vcmask 130048   ;;  %s526_s15 = scalar_lea.vmem %s1596_s1, %s1615_s22  ;;  %vm662_vm4 = vcmask 64512  }
   0xe   : > { %1261 = vmatpush3.bf16.msra.mxu0 %v1336_v0  ;;  %1264 = vmatprep.mubr.msk.bf16.mxu0 %vm1369_vm0, %v1368_v1  ;;  %s523_s29 = scalar_lea.vmem %s1613_s28, %s1207_s25  ;;  %v1213_v17 = vld [vmem:[%s526_s15] ss:$0 sm:$0xff]  ;;  %vm680_vm5 = vcmask 1043456   ;;  %v1338_v52 = vld [vmem:[%s1599_s4 + $0x8] sm:$0xff]   ;;  %vm842_vm6 = vcmask 261248   ;;  %vm1061_vm7 = vcmask 523264   ;;  %s530_s0 = scalar_lea.vmem %s1611_s16, %s1207_s25 }
   0xf   : > { %1262 = vmatprep.subr.bf16.mxu0 %v1368_v1  ;;  %1270 = vmatprep.mubr.msk.bf16.mxu1 %vm1369_vm0, %v1368_v1  ;;  %v1491_v3 = vld [vmem:[%s523_s29] sm:$0xf]  ;;  %vm1138_vm8 = vcmask 257024  }
  0x10   : > { %v1339_v53 = vld [vmem:[%s1599_s4] sm:$0xff]  }
  0x12   : > { %1263 = vmatpush3.bf16.msra.mxu0 %v1337_v2  ;;  %v1218_v2 = vld [vmem:[%s1600_s5] ss:$0 sm:$0xff] }
  0x13   : > { %1274 = vmatprep.subr.bf16.mxu0 %v1368_v1 }
  0x15   : > { %1265 = vmatmul.mubr.msk.bf16.vlgmr.msra.gmra.mxu0 %vm558_vm1, %v1491_v3 }
  0x16   : > { %1276 = vmatprep.mubr.msk.bf16.mxu0 %vm1369_vm0, %v1368_v1 }
  0xd5   : > { %v596_v5 = vpop.f32.mrf.mxu0 }
  0xd6   : > { %v597_v6 = vadd.f32 %v1209_v4, %v596_v5  ;;  %v533_v4 = vunpack.c.l.bf16 %v1491_v3  ;;  %v1341_v3 = vld [vmem:[%s1603_s8] sm:$0xff]  }
  0xd7   : > { %v1266_v7 = vpop.f32.mrf.mxu0 }
  0xd8   : > { %603 = vst.msk [vmem:[#allocation2] sm:$0xff] %vm602_vm2, %v597_v6 }
  0xd9   : > { %v599_v8 = vpop.f32.mrf.mxu0 }
  0xdb   : > { %v1267_v9 = vpop.f32.mrf.mxu0 }
  0xdf   : > { %v725_v10 = vld [vmem:[#allocation2] sm:$0xff] }
  0xe0   : > { %v726_v11 = vpack.c.bf16 %v725_v10, %v725_v10 }
  0xe2   : > { %728 = vrot.lane.b32.xlu1 %v726_v11, %s1370_s17  ;;  %613 = vrot.lane.b32.xlu0 %v726_v11, %s1371_s18 }
  0xe6   : > { %730 = vrot.lane.b32.xlu0 %v726_v11, %s1372_s19 }
 0x154   : > { %v614_v12 = vpop.permute.xlu0 %613  ;;  %v729_v16 = vpop.permute.xlu1 %728 }
 0x155   : > { %v620_v13 = vsel %vm615_vm3, %v614_v12, 0 }
 0x156   : > { %1269 = vmatpush3.bf16.xpose.msra.mxu1 %v620_v13 }
 0x157   : > { %1280 = vmatprep.subr.bf16.mxu1 %v1368_v1 }
 0x158   : > { %v731_v14 = vpop.permute.xlu0 %730 }
 0x159   : > { %v736_v15 = vsel %vm615_vm3, %v731_v14, 0  ;;  %v1340_v14 = vld [vmem:[%s1603_s8 + $0x8] sm:$0xff]  }
 0x15d   : > { %1271 = vmatmul.mubr.msk.bf16.vlgmr.msra.gmra.mxu1 %vm615_vm3, %v726_v11 }
 0x15e   : > { %1281 = vmatpush3.bf16.xpose.msra.mxu1 %v736_v15  ;;  %1282 = vmatprep.mubr.msk.bf16.mxu1 %vm1369_vm0, %v1368_v1 }
 0x15f   : > { %1292 = vmatprep.subr.bf16.mxu1 %v1368_v1 }
 0x165   : > { %1283 = vmatmul.mubr.msk.bf16.vlgmr.msra.gmra.mxu1 %vm615_vm3, %v729_v16 }
 0x166   : > { %1296 = vmatprep.mubr.msk.bf16.mxu1 %vm1369_vm0, %v1368_v1  ;;  %1293 = vmatpush3.bf16.msra.mxu1 %v1338_v52 }
 0x167   : > { %1294 = vmatprep.subr.bf16.mxu1 %v1368_v1 }
 0x16a   : > { %1295 = vmatpush3.bf16.msra.mxu1 %v1339_v53 }
 0x16b   : > { %1308 = vmatprep.subr.bf16.mxu1 %v1368_v1 }
 0x21d   : > { %v656_v18 = vpop.f32.mrf.mxu1 }
 0x21e   : > { %v657_v19 = vadd.f32 %v1213_v17, %v656_v18 }
 0x21f   : > { %v1272_v20 = vpop.f32.mrf.mxu1 }
 0x220   : > { %v663_v21 = vsel %vm662_vm4, %v657_v19, -inf }
 0x221   : > { %664 = vmax.xlane.f32.xlu1 %v663_v21  ;;  %v659_v22 = vpop.f32.mrf.mxu1 }
 0x223   : > { %v1273_v23 = vpop.f32.mrf.mxu1 }
 0x225   : > { %v772_v24 = vpop.f32.mrf.mxu1 }
 0x226   : > { %v773_v25 = vadd.f32 %v1213_v17, %v772_v24  ;;  %v1222_v24 = vld [vmem:[%s1601_s6] ss:$0 sm:$0xff] }
 0x227   : > { %v1284_v26 = vpop.f32.mrf.mxu1 }
 0x228   : > { %v778_v27 = vsel %vm662_vm4, %v773_v25, -inf  ;;  %v1223_v26 = vld [vmem:[%s1602_s7] ss:$0 sm:$0xff] }
 0x229   : > { %779 = vmax.xlane.f32.xlu0 %v778_v27  ;;  %v775_v28 = vpop.f32.mrf.mxu1 }
 0x22b   : > { %v1285_v29 = vpop.f32.mrf.mxu1 }
 0x2aa   : > { %v665_v30 = vpop.xlane.xlu1 %664 }
 0x2ab   : > { %v666_v31 = vsub.f32 %v657_v19, %v665_v30  ;;  %v1342_v30 = vld [vmem:[%s1605_s10 + $0x18] sm:$0xff]  }
 0x2ad   : > { %v667_v32 = vmul.f32 1.442695, %v666_v31  ;;  %v1343_v31 = vld [vmem:[%s1605_s10 + $0x10] sm:$0xff]  }
 0x2af   : > { %1346 = vpow2.f32 %v667_v32  ;;  %v1344_v32 = vld [vmem:[%s1605_s10 + $0x8] sm:$0xff]  }
 0x2b2   : > { %v780_v33 = vpop.xlane.xlu0 %779 }
 0x2b3   : > { %v781_v34 = vsub.f32 %v773_v25, %v780_v33  ;;  %v1345_v33 = vld [vmem:[%s1605_s10] sm:$0xff]  }
 0x2b5   : > { %v782_v35 = vmul.f32 1.442695, %v781_v34  ;;  %v1224_v34 = vld [vmem:[%s1604_s9] ss:$0 sm:$0xff] }
 0x2b7   : > { %1348 = vpow2.f32 %v782_v35 }
 0x2bc   : > { %v1347_v36 = vpop.eup %1346 }
 0x2bd   : > { %v669_v37 = vsel %vm662_vm4, %v1347_v36, 0.0 }
 0x2be   : > { %670 = vadd.xlane.f32.xlu0 %v669_v37 }
 0x2c4   : > { %v1349_v38 = vpop.eup %1348 }
 0x2c5   : > { %v784_v39 = vsel %vm662_vm4, %v1349_v38, 0.0 }
 0x2c6   : > { %785 = vadd.xlane.f32.xlu1 %v784_v39 }
 0x2d4   : > { %675 = vrot.lane.b32.xlu0 %v726_v11, %s1373_s23 }
 0x2d7   : > { %790 = vrot.lane.b32.xlu1 %v726_v11, %s1374_s24 }
 0x347   : > { %v671_v40 = vpop.xlane.xlu0 %670 }
 0x348   : > { %1350 = vrcp.f32 %v671_v40 }
 0x34b   : > { %v676_v41 = vpop.permute.xlu0 %675 }
 0x34c   : > { %v682_v42 = vsel %vm680_vm5, %v676_v41, 0 }
 0x34d   : > { %1275 = vmatpush3.bf16.msra.mxu0 %v682_v42 }
 0x34e   : > { %1286 = vmatprep.subr.bf16.mxu0 %v1368_v1 }
 0x34f   : > { %v786_v43 = vpop.xlane.xlu1 %785 }
 0x350   : > { %1352 = vrcp.f32 %v786_v43 }
 0x353   : > { %v791_v46 = vpop.permute.xlu1 %790 }
 0x354   : > { %v796_v48 = vsel %vm680_vm5, %v791_v46, 0 }
 0x355   : > { %v1351_v44 = vpop.eup %1350 }
 0x356   : > { %v673_v45 = vmul.f32 %v1351_v44, %v1347_v36 }
 0x358   : > { %v674_v47 = vpack.c.bf16 %v673_v45, %v673_v45 }
 0x35a   : > { %1277 = vmatmul.mubr.msk.bf16.vlgmr.msra.gmra.mxu0 %vm662_vm4, %v674_v47 }
 0x35b   : > { %1287 = vmatpush3.bf16.msra.mxu0 %v796_v48  ;;  %1288 = vmatprep.mubr.msk.bf16.mxu0 %vm1369_vm0, %v1368_v1 }
 0x35c   : > { %1300 = vmatprep.subr.bf16.mxu0 %v1368_v1 }
 0x35d   : > { %v1353_v49 = vpop.eup %1352 }
 0x35e   : > { %v788_v50 = vmul.f32 %v1353_v49, %v1349_v38  ;;  %v1228_v49 = vld [vmem:[%s1606_s11] ss:$0 sm:$0xff] }
 0x360   : > { %v789_v51 = vpack.c.bf16 %v788_v50, %v788_v50 }
 0x362   : > { %1289 = vmatmul.mubr.msk.bf16.vlgmr.msra.gmra.mxu0 %vm662_vm4, %v789_v51 }
 0x363   : > { %1304 = vmatprep.mubr.msk.bf16.mxu0 %vm1369_vm0, %v1368_v1  ;;  %1301 = vmatpush3.bf16.msra.mxu0 %v1340_v14 }
 0x364   : > { %1302 = vmatprep.subr.bf16.mxu0 %v1368_v1 }
 0x367   : > { %1303 = vmatpush3.bf16.msra.mxu0 %v1341_v3 }
 0x41a   : > { %v718_v54 = vpop.f32.mrf.mxu0 }
 0x41b   : > { %724 = vst.msk [vmem:[#allocation3] sm:$0xff] %vm615_vm3, %v718_v54 }
 0x41c   : > { %v1278_v55 = vpop.f32.mrf.mxu0 }
 0x41e   : > { %v721_v56 = vpop.f32.mrf.mxu0 }
 0x420   : > { %v1279_v57 = vpop.f32.mrf.mxu0 }
 0x422   : > { %v832_v58 = vpop.f32.mrf.mxu0 }
 0x423   : > { %839 = vrot.lane.b32.xlu1 %v832_v58, %s1375_s30 }
 0x424   : > { %v1290_v59 = vpop.f32.mrf.mxu0 }
 0x426   : > { %v835_v60 = vpop.f32.mrf.mxu0 }
 0x428   : > { %v1291_v61 = vpop.f32.mrf.mxu0 }
 0x495   : > { %v840_v62 = vpop.permute.xlu1 %839 }
 0x496   : > { %843 = vst.msk [vmem:[#allocation3] sm:$0xff] %vm842_vm6, %v840_v62 }
 0x49d   : > { %v844_v63 = vld [vmem:[#allocation3] sm:$0xff] }
 0x49e   : > { %v845_v0 = vpack.c.bf16 %v844_v63, %v844_v63 }
 0x4a0   : > { %1297 = vmatmul.mubr.msk.bf16.vlgmr.msra.gmra.mxu1 %vm558_vm1, %v845_v0 }
 0x4a1   : > { %1316 = vmatprep.mubr.msk.bf16.mxu1 %vm1369_vm0, %v1368_v1  ;;  %1309 = vmatpush3.bf16.msra.mxu1 %v1342_v30 }
 0x4a2   : > { %1310 = vmatprep.subr.bf16.mxu1 %v1368_v1 }
 0x4a5   : > { %1311 = vmatpush3.bf16.msra.mxu1 %v1343_v31 }
 0x4a6   : > { %1312 = vmatprep.subr.bf16.mxu1 %v1368_v1 }
 0x4a9   : > { %1313 = vmatpush3.bf16.msra.mxu1 %v1344_v32 }
 0x4aa   : > { %1314 = vmatprep.subr.bf16.mxu1 %v1368_v1 }
 0x4ad   : > { %1315 = vmatpush3.bf16.msra.mxu1 %v1345_v33 }
 0x560   : > { %v906_v5 = vpop.f32.mrf.mxu1 }
 0x561   : > { %v907_v6 = vadd.f32 %v1218_v2, %v906_v5 }
 0x562   : > { %v1298_v7 = vpop.f32.mrf.mxu1 }
 0x563   : > { %v912_v8 = vadd.f32 %v907_v6, %v533_v4  ;;  %v1234_v6 = vld [vmem:[%s1607_s12] ss:$0 sm:$0xff] }
 0x564   : > { %v909_v9 = vpop.f32.mrf.mxu1 }
 0x565   : > { %v915_v10 = vsel %vm558_vm1, %v912_v8, 0.0  ;;  %v920_v11 = vmul.f32 %v912_v8, %v912_v8 }
 0x566   : > { %v1299_v12 = vpop.f32.mrf.mxu1  ;;  %916 = vadd.xlane.f32.xlu0 %v915_v10 }
 0x567   : > { %v921_v13 = vsel %vm558_vm1, %v920_v11, 0.0 }
 0x568   : > { %922 = vadd.xlane.f32.xlu1 %v921_v13 }
 0x5ef   : > { %v917_v15 = vpop.xlane.xlu0 %916 }
 0x5f0   : > { %v919_v16 = vmul.f32 0.03125, %v917_v15 }
 0x5f1   : > { %v923_v17 = vpop.xlane.xlu1 %922 }
 0x5f2   : > { %v925_v18 = vmul.f32 %v919_v16, %v919_v16  ;;  %v924_v19 = vmul.f32 0.03125, %v923_v17  ;;  %v927_v22 = vsub.f32 %v912_v8, %v919_v16  ;;  %v1235_v8 = vld [vmem:[%s1608_s13] ss:$0 sm:$0xff] }
 0x5f4   : > { %v926_v20 = vsub.f32 %v924_v19, %v925_v18 }
 0x5f6   : > { %v928_v21 = vadd.f32 1e-12, %v926_v20 }
 0x5f8   : > { %1354 = vrsqrt.f32 %v928_v21 }
 0x605   : > { %v1355_v23 = vpop.eup %1354 }
 0x606   : > { %v930_v25 = vmul.f32 %v1355_v23, %v927_v22 }
 0x608   : > { %v937_v27 = vmul.f32 %v1222_v24, %v930_v25 }
 0x60a   : > { %v944_v28 = vadd.f32 %v1223_v26, %v937_v27 }
 0x60c   : > { %v945_v29 = vpack.c.bf16 %v944_v28, %v944_v28 }
 0x60e   : > { %1305 = vmatmul.mubr.msk.bf16.vlgmr.msra.gmra.mxu0 %vm558_vm1, %v945_v29 }
 0x6ce   : > { %v1006_v35 = vpop.f32.mrf.mxu0 }
 0x6cf   : > { %v1007_v36 = vadd.f32 %v1224_v34, %v1006_v35 }
 0x6d0   : > { %v1306_v37 = vpop.f32.mrf.mxu0 }
 0x6d1   : > { %v1012_v38 = vmul.f32 %v1007_v36, %v1007_v36 }
 0x6d2   : > { %v1009_v39 = vpop.f32.mrf.mxu0 }
 0x6d3   : > { %v1013_v40 = vmul.f32 %v1012_v38, %v1007_v36 }
 0x6d4   : > { %v1307_v41 = vpop.f32.mrf.mxu0 }
 0x6d5   : > { %v1014_v42 = vmul.f32 0.044715, %v1013_v40 }
 0x6d7   : > { %v1015_v43 = vadd.f32 %v1014_v42, %v1007_v36 }
 0x6d9   : > { %v1016_v44 = vmul.f32 0.7978846, %v1015_v43 }
 0x6db   : > { %1356 = vtanh.f32 %v1016_v44 }
 0x6e8   : > { %v1357_v1 = vpop.eup %1356 }
 0x6e9   : > { %v1018_v45 = vadd.f32 1.0, %v1357_v1 }
 0x6eb   : > { %v1019_v46 = vmul.f32 0.5, %v1018_v45 }
 0x6ed   : > { %v1020_v47 = vmul.f32 %v1019_v46, %v1007_v36 }
 0x6ef   : > { %v1021_v48 = vpack.c.bf16 %v1020_v47, %v1020_v47 }
 0x6f1   : > { %1317 = vmatmul.mubr.msk.bf16.vlgmr.msra.gmra.mxu1 %vm1061_vm7, %v1021_v48 }
 0x7b1   : > { %v1099_v50 = vpop.f32.mrf.mxu1 }
 0x7b2   : > { %v1100_v51 = vadd.f32 %v1228_v49, %v1099_v50 }
 0x7b3   : > { %v1318_v52 = vpop.f32.mrf.mxu1 }
 0x7b4   : > { %v1105_v53 = vadd.f32 %v1100_v51, %v944_v28 }
 0x7b5   : > { %v1102_v54 = vpop.f32.mrf.mxu1 }
 0x7b6   : > { %v1108_v55 = vsel %vm558_vm1, %v1105_v53, 0.0  ;;  %v1112_v56 = vmul.f32 %v1105_v53, %v1105_v53 }
 0x7b7   : > { %1109 = vadd.xlane.f32.xlu0 %v1108_v55  ;;  %v1319_v57 = vpop.f32.mrf.mxu1 }
 0x7b8   : > { %v1113_v58 = vsel %vm558_vm1, %v1112_v56, 0.0 }
 0x7bb   : > { %1114 = vadd.xlane.f32.xlu0 %v1113_v58 }
 0x840   : > { %v1110_v59 = vpop.xlane.xlu0 %1109 }
 0x841   : > { %v1111_v60 = vmul.f32 0.03125, %v1110_v59 }
 0x843   : > { %v1117_v62 = vmul.f32 %v1111_v60, %v1111_v60  ;;  %v1119_v4 = vsub.f32 %v1105_v53, %v1111_v60 }
 0x844   : > { %v1115_v61 = vpop.xlane.xlu0 %1114 }
 0x845   : > { %v1116_v63 = vmul.f32 0.03125, %v1115_v61 }
 0x847   : > { %v1118_v0 = vsub.f32 %v1116_v63, %v1117_v62 }
 0x849   : > { %v1120_v2 = vadd.f32 1e-12, %v1118_v0 }
 0x84b   : > { %1358 = vrsqrt.f32 %v1120_v2 }
 0x858   : > { %v1359_v5 = vpop.eup %1358 }
 0x859   : > { %v1122_v7 = vmul.f32 %v1359_v5, %v1119_v4 }
 0x85b   : > { %v1129_v9 = vmul.f32 %v1234_v6, %v1122_v7 }
 0x85d   : > { %v1136_v10 = vadd.f32 %v1235_v8, %v1129_v9 }
 0x85f   : > { %v1137_v11 = vpack.c.bf16 %v1136_v10, %v1136_v10 }
 0x861   : > { %1139 = vst.msk [vmem:[%s530_s0] sm:$0xf] %vm1138_vm8, %v1137_v11 }
 0x862 PF: > { %s26_s21 = sadd.s32 1, %s1366_s21  }
 0x863   : > { %p23_p4 = scmp.ge.s32.totalorder %s26_s21, 4  }
 0x865   :  { %25 = sbr.rel (!%p23_p4) target bundleno = 2 (0x2), region = 117 }

</bundles_post_ra>
